<compile_context>
chip_gen: v7x
topology: tpu7x:2x2x1
jax: 0.10.0
libtpu: 0.0.40
codegen_flags: <defaults>
</compile_context>

<pallas_src>
import numpy as np
import jax
import jax.numpy as jnp
from jax.experimental import pallas as pl
from jax.experimental.pallas import tpu as pltpu


# ---------------------------------------------------------------------------
# Fused kernel
# ---------------------------------------------------------------------------
def _fused_forward_kernel(
    xcat_ref,                          # (T*BP, 2D)  time-major [x_len_t | x_dep_t], batch padded
    wih_f_ref, whh_f_ref, b_f_ref,     # fwd dirs, block-diag, gate-grouped: (2D,8H) (2H,8H) (1,8H)
    wih_b_ref, b_b_ref,                # bwd dirs (zero-state shortcut):     (2D,8H) (1,8H)
    wo_f_ref, wo_b_ref, bo_ref,        # head: (2H,CP) (2H,CP) (1,CP)  (lane-padded, pad bias=-1e30)
    out_ref,                           # (BP, CP) softmax probabilities (valid region [:B,:C])
    pre_ref,                           # scratch (T*BP, 8H)
):
    BP = out_ref.shape[0]
    H2 = whh_f_ref.shape[0]            # 2H  (both paths' hidden, concatenated)
    H6 = 3 * H2                        # width of the sigmoid gates [i_l,i_d,f_l,f_d,o_l,o_d]
    T = xcat_ref.shape[0] // BP

    # ---- input->gate contributions for ALL timesteps of BOTH paths: ONE MXU op ----
    pre_ref[...] = (
        jnp.dot(xcat_ref[...], wih_f_ref[...], preferred_element_type=jnp.float32)
        + b_f_ref[...]
    )

    whh = whh_f_ref[...]
    h = jnp.zeros((BP, H2), jnp.float32)        # [h_len | h_dep]
    c = jnp.zeros((BP, H2), jnp.float32)

    # Fully-unrolled serial time loop; ONE matmul per step drives BOTH forward recurrences
    # (block-diagonal W_hh).  Gate columns are pre-permuted so sigmoid covers only the first
    # 6H lanes and tanh only the last 2H lanes.
    for t in range(T):
        gates = pre_ref[t * BP:(t + 1) * BP, :] + jnp.dot(
            h, whh, preferred_element_type=jnp.float32)
        sg = jax.nn.sigmoid(gates[:, :H6])
        g = jnp.tanh(gates[:, H6:])
        i = sg[:, 0:H2]
        f = sg[:, H2:2 * H2]
        o = sg[:, 2 * H2:3 * H2]
        c = f * c + i * g
        h = o * jnp.tanh(c)

    # ---- backward directions at t = T-1 (zero initial state => W_hh term is exactly 0) ----
    x_last = xcat_ref[(T - 1) * BP:T * BP, :]
    gb = jnp.dot(x_last, wih_b_ref[...], preferred_element_type=jnp.float32) + b_b_ref[...]
    sgb = jax.nn.sigmoid(gb[:, :H6])
    ggb = jnp.tanh(gb[:, H6:])
    hb = sgb[:, 2 * H2:3 * H2] * jnp.tanh(sgb[:, 0:H2] * ggb)    # o * tanh(i * g), both paths

    # ---- head: 2 matmuls (Linear rows re-grouped at prep time) + numerically stable softmax
    logits = (
        jnp.dot(h, wo_f_ref[...], preferred_element_type=jnp.float32)
        + jnp.dot(hb, wo_b_ref[...], preferred_element_type=jnp.float32)
        + bo_ref[...]
    )
    m = jnp.max(logits, axis=-1, keepdims=True)
    e = jnp.exp(logits - m)
    out_ref[...] = e / jnp.sum(e, axis=-1, keepdims=True)


# ---------------------------------------------------------------------------
# Wrapper
# ---------------------------------------------------------------------------
def fused_forward(x, fused, num_classes):
    """x: (B, T, D) with T == D. Returns softmax probabilities (B, num_classes)."""
    B, T, D = x.shape
    assert T == D, "model expects square images (seq_len == img_dim)"
    BP = ((B + 7) // 8) * 8            # sublane-pad the batch
    H = fused["whh_f"].shape[0] // 2
    CP = fused["wo_f"].shape[1]        # lane-padded class dim

    # Time-major slabs with both paths' step-t inputs side by side, batch padded to BP:
    #   row (t*BP + b) = [ x[b, t, :] | x[b, :, t] ]
    xl = jnp.transpose(x, (1, 0, 2))                       # (T, B, D)
    xd = jnp.transpose(x, (2, 0, 1))                       # (T, B, D)   (T == D)
    xcat = jnp.concatenate([xl, xd], axis=-1)              # (T, B, 2D)
    xcat = jnp.pad(xcat, ((0, 0), (0, BP - B), (0, 0)))    # (T, BP, 2D)
    xcat2 = xcat.reshape(T * BP, 2 * D)

    args = (xcat2,
            fused["wih_f"], fused["whh_f"], fused["b_f"],
            fused["wih_b"], fused["b_b"],
            fused["wo_f"], fused["wo_b"], fused["bo"])

    def full_spec(a):
        return pl.BlockSpec(a.shape, lambda: (0,) * a.ndim)

    flops = int(
        2 * (T * BP) * (2 * D) * (8 * H)        # all-timestep input->gate precompute
        + T * 2 * BP * (2 * H) * (8 * H)        # fused recurrent matmuls
        + 2 * BP * (2 * D) * (8 * H)            # backward-direction shortcut
        + 2 * 2 * BP * (2 * H) * CP             # head
    )
    transcendentals = int((T + 1) * BP * 10 * H + BP * CP)
    bytes_accessed = int(4 * (xcat2.size + sum(a.size for a in args[1:]) + BP * CP))

    out = pl.pallas_call(
        _fused_forward_kernel,
        out_shape=jax.ShapeDtypeStruct((BP, CP), jnp.float32),
        in_specs=[full_spec(a) for a in args],
        out_specs=pl.BlockSpec((BP, CP), lambda: (0, 0)),
        scratch_shapes=[pltpu.VMEM((T * BP, 8 * H), jnp.float32)],
        cost_estimate=pl.CostEstimate(
            flops=flops, transcendentals=transcendentals, bytes_accessed=bytes_accessed),
    )(*args)
    # TODO(synk): for very large batches, add a batch grid axis with
    #             dimension_semantics=("parallel",) to use both v7x TensorCores.
    return out[:B, :num_classes]


model_forward = jax.jit(fused_forward, static_argnames=("num_classes",))


# ---------------------------------------------------------------------------
# Parameters (PyTorch-style U(-1/sqrt(H), 1/sqrt(H)) init, pre-transposed)
# and prep into the fused/block-diagonal/gate-grouped layout used by the kernel.
# ---------------------------------------------------------------------------
def _init_dir(key, input_size, hidden_size):
    k = 1.0 / np.sqrt(hidden_size)
    k1, k2, k3, k4 = jax.random.split(key, 4)
    w_ih = jax.random.uniform(k1, (4 * hidden_size, input_size), jnp.float32, -k, k)
    w_hh = jax.random.uniform(k2, (4 * hidden_size, hidden_size), jnp.float32, -k, k)
    b_ih = jax.random.uniform(k3, (4 * hidden_size,), jnp.float32, -k, k)
    b_hh = jax.random.uniform(k4, (4 * hidden_size,), jnp.float32, -k, k)
    return w_ih.T, w_hh.T, (b_ih + b_hh)[None, :]


def init_params(key, img_dim, num_classes, hidden_size):
    keys = jax.random.split(key, 6)
    params = {
        "len": {"fwd": _init_dir(keys[0], img_dim, hidden_size),
                "bwd": _init_dir(keys[1], img_dim, hidden_size)},
        "dep": {"fwd": _init_dir(keys[2], img_dim, hidden_size),
                "bwd": _init_dir(keys[3], img_dim, hidden_size)},
    }
    kl = 1.0 / np.sqrt(hidden_size * 4)
    w = jax.random.uniform(keys[4], (num_classes, hidden_size * 4), jnp.float32, -kl, kl)
    b = jax.random.uniform(keys[5], (num_classes,), jnp.float32, -kl, kl)
    params["linear_w_t"] = w.T          # (4H, C)
    params["linear_b"] = b[None, :]     # (1, C)
    return params


def _split_gates(w, H):
    """(K, 4H) in PyTorch (i, f, g, o) order -> per-gate blocks in (i, f, o, g) order."""
    return w[:, 0:H], w[:, H:2 * H], w[:, 3 * H:4 * H], w[:, 2 * H:3 * H]


def _blockdiag2(a, b):
    za = jnp.zeros((a.shape[0], b.shape[1]), a.dtype)
    zb = jnp.zeros((b.shape[0], a.shape[1]), b.dtype)
    return jnp.concatenate([jnp.concatenate([a, za], axis=1),
                            jnp.concatenate([zb, b], axis=1)], axis=0)


def _fuse_weights(w_len, w_dep, H):
    """Per-path (K, 4H) -> fused block-diag (2K, 8H), cols [i_l,i_d,f_l,f_d,o_l,o_d,g_l,g_d]."""
    gl = _split_gates(w_len, H)
    gd = _split_gates(w_dep, H)
    return jnp.concatenate([_blockdiag2(a, b) for a, b in zip(gl, gd)], axis=1)


def _fuse_bias(b_len, b_dep, H):
    gl = _split_gates(b_len, H)
    gd = _split_gates(b_dep, H)
    return jnp.concatenate([x for pair in zip(gl, gd) for x in pair], axis=1)   # (1, 8H)


def prepare_fused_params(params):
    H = params["len"]["fwd"][1].shape[0]
    wih_lf, whh_lf, b_lf = params["len"]["fwd"]
    wih_lb, _whh_lb, b_lb = params["len"]["bwd"]     # W_hh of backward dirs provably unused
    wih_df, whh_df, b_df = params["dep"]["fwd"]
    wih_db, _whh_db, b_db = params["dep"]["bwd"]

    fused = {
        "wih_f": _fuse_weights(wih_lf, wih_df, H),   # (2D, 8H)
        "whh_f": _fuse_weights(whh_lf, whh_df, H),   # (2H, 8H)
        "b_f":   _fuse_bias(b_lf, b_df, H),          # (1, 8H)
        "wih_b": _fuse_weights(wih_lb, wih_db, H),   # (2D, 8H)
        "b_b":   _fuse_bias(b_lb, b_db, H),          # (1, 8H)
    }

    # Head: PyTorch feature order is [h_len_fwd, h_len_bwd, h_dep_fwd, h_dep_bwd];
    # fused states are h_cat = [h_len_fwd | h_dep_fwd] and hb_cat = [h_len_bwd | h_dep_bwd].
    wo = params["linear_w_t"]            # (4H, C)
    bo = params["linear_b"]              # (1, C)
    C = wo.shape[1]
    CP = -(-C // 128) * 128              # lane-pad to a multiple of 128
    pad = CP - C
    wo_f = jnp.concatenate([wo[0:H], wo[2 * H:3 * H]], axis=0)        # (2H, C)
    wo_b = jnp.concatenate([wo[H:2 * H], wo[3 * H:4 * H]], axis=0)    # (2H, C)
    fused["wo_f"] = jnp.pad(wo_f, ((0, 0), (0, pad)))
    fused["wo_b"] = jnp.pad(wo_b, ((0, 0), (0, pad)))
    fused["bo"] = jnp.pad(bo, ((0, 0), (0, pad)), constant_values=-1e30)  # padded cols -> exp==0
    return fused


# ---------------------------------------------------------------------------
# Pure-JAX reference (full forward + full reverse scans; validates the
# zero-state backward shortcut and all fusions used by the kernel).
# ---------------------------------------------------------------------------
def _ref_lstm_all_outputs(x_tm, w_ih_t, w_hh_t, b):
    B = x_tm.shape[1]
    H = w_hh_t.shape[0]

    def cell(carry, x_t):
        h, c = carry
        g = x_t @ w_ih_t + h @ w_hh_t + b
        i = jax.nn.sigmoid(g[:, :H])
        f = jax.nn.sigmoid(g[:, H:2 * H])
        gg = jnp.tanh(g[:, 2 * H:3 * H])
        o = jax.nn.sigmoid(g[:, 3 * H:])
        c = f * c + i * gg
        h = o * jnp.tanh(c)
        return (h, c), h

    init = (jnp.zeros((B, H), jnp.float32), jnp.zeros((B, H), jnp.float32))
    _, hs = jax.lax.scan(cell, init, x_tm)
    return hs


def _ref_bidir_last_features(x, p_fwd, p_bwd):
    x_tm = jnp.transpose(x, (1, 0, 2))                       # (T, B, D)
    h_fwd_last = _ref_lstm_all_outputs(x_tm, *p_fwd)[-1]
    hs_bwd = _ref_lstm_all_outputs(x_tm[::-1], *p_bwd)
    h_bwd_last = hs_bwd[0]
    return jnp.concatenate([h_fwd_last, h_bwd_last], axis=1)


def _ref_forward(x, params):
    lf = _ref_bidir_last_features(x, params["len"]["fwd"], params["len"]["bwd"])
    df = _ref_bidir_last_features(jnp.transpose(x, (0, 2, 1)),
                                  params["dep"]["fwd"], params["dep"]["bwd"])
    cat = jnp.concatenate([lf, df], axis=1)
    logits = cat @ params["linear_w_t"] + params["linear_b"]
    return jax.nn.softmax(logits, axis=-1)


if __name__ == "__main__":
    B, IMG_DIM, HIDDEN, NUM_CLASSES = 2, 16, 32, 8

    key = jax.random.PRNGKey(0)
    k_x, k_p = jax.random.split(key)
    # x: (batch, seq_len, img_dim) with seq_len == img_dim (square "image")
    x = jax.random.normal(k_x, (B, IMG_DIM, IMG_DIM), dtype=jnp.float32)
    params = init_params(k_p, IMG_DIM, NUM_CLASSES, HIDDEN)
    fused = prepare_fused_params(params)

    out = model_forward(x, fused, num_classes=NUM_CLASSES)
    jax.block_until_ready(out)

    ref = _ref_forward(x, params)
    assert out.shape == (B, NUM_CLASSES)
    np.testing.assert_allclose(np.asarray(out), np.asarray(ref), rtol=1e-5, atol=1e-5)
    np.testing.assert_allclose(np.asarray(out).sum(axis=-1), 1.0, rtol=1e-5, atol=1e-5)

    print("KERNEL_OK")
</pallas_src>

<mosaic_0001>
module attributes {stable_mosaic.version = 11 : i64} {
  func.func @_fused_forward_kernel(%arg0: memref<128x32xf32, #tpu.memory_space<vmem>>, %arg1: memref<32x256xf32, #tpu.memory_space<vmem>>, %arg2: memref<64x256xf32, #tpu.memory_space<vmem>>, %arg3: memref<1x256xf32, #tpu.memory_space<vmem>>, %arg4: memref<32x256xf32, #tpu.memory_space<vmem>>, %arg5: memref<1x256xf32, #tpu.memory_space<vmem>>, %arg6: memref<64x128xf32, #tpu.memory_space<vmem>>, %arg7: memref<64x128xf32, #tpu.memory_space<vmem>>, %arg8: memref<1x128xf32, #tpu.memory_space<vmem>>, %arg9: memref<8x128xf32, #tpu.memory_space<vmem>>, %arg10: memref<128x256xf32, #tpu.memory_space<vmem>>) attributes {dimension_semantics = [], scalar_prefetch = 0 : i64, scratch_operands = 1 : i64, tpu.core_type = #tpu.core_type<tc>} {
    %c0 = arith.constant 0 : index
    %c0_0 = arith.constant 0 : index
    %0 = vector.load %arg0[%c0, %c0_0] : memref<128x32xf32, #tpu.memory_space<vmem>>, vector<128x32xf32>
    %c0_1 = arith.constant 0 : index
    %c0_2 = arith.constant 0 : index
    %1 = vector.load %arg1[%c0_1, %c0_2] : memref<32x256xf32, #tpu.memory_space<vmem>>, vector<32x256xf32>
    %cst = arith.constant dense<0.000000e+00> : vector<128x256xf32>
    %2 = tpu.matmul %0, %1, %cst {dimension_numbers = #tpu.dot_dimension_numbers<[1], [0], [0], [1], [0, 0, 1, 1], [], []>} : vector<128x32xf32>, vector<32x256xf32>, vector<128x256xf32> -> vector<128x256xf32>
    %c0_3 = arith.constant 0 : index
    %c0_4 = arith.constant 0 : index
    %3 = vector.load %arg3[%c0_3, %c0_4] : memref<1x256xf32, #tpu.memory_space<vmem>>, vector<1x256xf32>
    %4 = vector.broadcast %3 : vector<1x256xf32> to vector<128x256xf32>
    %5 = arith.addf %2, %4 : vector<128x256xf32>
    %c0_5 = arith.constant 0 : index
    %c0_6 = arith.constant 0 : index
    %6 = vector.load %arg10[%c0_5, %c0_6] : memref<128x256xf32, #tpu.memory_space<vmem>>, vector<128x256xf32>
    tpu.vector_store %arg10[%c0_5, %c0_6], %5 {strides = array<i32>} : memref<128x256xf32, #tpu.memory_space<vmem>>, vector<128x256xf32>,
    %c0_7 = arith.constant 0 : index
    %c0_8 = arith.constant 0 : index
    %7 = vector.load %arg2[%c0_7, %c0_8] : memref<64x256xf32, #tpu.memory_space<vmem>>, vector<64x256xf32>
    %cst_9 = arith.constant 0.000000e+00 : f32
    %8 = vector.broadcast %cst_9 : f32 to vector<8x64xf32>
    %cst_10 = arith.constant 0.000000e+00 : f32
    %9 = vector.broadcast %cst_10 : f32 to vector<8x64xf32>
    %c0_11 = arith.constant 0 : index
    %c0_12 = arith.constant 0 : index
    %10 = vector.load %arg10[%c0_11, %c0_12] : memref<128x256xf32, #tpu.memory_space<vmem>>, vector<8x256xf32>
    %cst_13 = arith.constant dense<0.000000e+00> : vector<8x256xf32>
    %11 = tpu.matmul %8, %7, %cst_13 {dimension_numbers = #tpu.dot_dimension_numbers<[1], [0], [0], [1], [0, 0, 1, 1], [], []>} : vector<8x64xf32>, vector<64x256xf32>, vector<8x256xf32> -> vector<8x256xf32>
    %12 = arith.addf %10, %11 : vector<8x256xf32>
    %13 = vector.extract_strided_slice %12 {offsets = [0, 0], sizes = [8, 192], strides = [1, 1]} : vector<8x256xf32> to vector<8x192xf32>
    %14 = arith.negf %13 : vector<8x192xf32>
    %15 = math.exp %14 : vector<8x192xf32>
    %cst_14 = arith.constant 1.000000e+00 : f32
    %16 = vector.broadcast %cst_14 : f32 to vector<8x192xf32>
    %17 = arith.addf %16, %15 : vector<8x192xf32>
    %18 = arith.divf %16, %17 : vector<8x192xf32>
    %19 = vector.extract_strided_slice %12 {offsets = [0, 192], sizes = [8, 64], strides = [1, 1]} : vector<8x256xf32> to vector<8x64xf32>
    %20 = math.tanh %19 : vector<8x64xf32>
    %21 = vector.extract_strided_slice %18 {offsets = [0, 0], sizes = [8, 64], strides = [1, 1]} : vector<8x192xf32> to vector<8x64xf32>
    %22 = vector.extract_strided_slice %18 {offsets = [0, 64], sizes = [8, 64], strides = [1, 1]} : vector<8x192xf32> to vector<8x64xf32>
    %23 = vector.extract_strided_slice %18 {offsets = [0, 128], sizes = [8, 64], strides = [1, 1]} : vector<8x192xf32> to vector<8x64xf32>
    %24 = arith.mulf %22, %9 : vector<8x64xf32>
    %25 = arith.mulf %21, %20 : vector<8x64xf32>
    %26 = arith.addf %24, %25 : vector<8x64xf32>
    %27 = math.tanh %26 : vector<8x64xf32>
    %28 = arith.mulf %23, %27 : vector<8x64xf32>
    %c8 = arith.constant 8 : index
    %c0_15 = arith.constant 0 : index
    %29 = vector.load %arg10[%c8, %c0_15] : memref<128x256xf32, #tpu.memory_space<vmem>>, vector<8x256xf32>
    %cst_16 = arith.constant dense<0.000000e+00> : vector<8x256xf32>
    %30 = tpu.matmul %28, %7, %cst_16 {dimension_numbers = #tpu.dot_dimension_numbers<[1], [0], [0], [1], [0, 0, 1, 1], [], []>} : vector<8x64xf32>, vector<64x256xf32>, vector<8x256xf32> -> vector<8x256xf32>
    %31 = arith.addf %29, %30 : vector<8x256xf32>
    %32 = vector.extract_strided_slice %31 {offsets = [0, 0], sizes = [8, 192], strides = [1, 1]} : vector<8x256xf32> to vector<8x192xf32>
    %33 = arith.negf %32 : vector<8x192xf32>
    %34 = math.exp %33 : vector<8x192xf32>
    %cst_17 = arith.constant 1.000000e+00 : f32
    %35 = vector.broadcast %cst_17 : f32 to vector<8x192xf32>
    %36 = arith.addf %35, %34 : vector<8x192xf32>
    %37 = arith.divf %35, %36 : vector<8x192xf32>
    %38 = vector.extract_strided_slice %31 {offsets = [0, 192], sizes = [8, 64], strides = [1, 1]} : vector<8x256xf32> to vector<8x64xf32>
    %39 = math.tanh %38 : vector<8x64xf32>
    %40 = vector.extract_strided_slice %37 {offsets = [0, 0], sizes = [8, 64], strides = [1, 1]} : vector<8x192xf32> to vector<8x64xf32>
    %41 = vector.extract_strided_slice %37 {offsets = [0, 64], sizes = [8, 64], strides = [1, 1]} : vector<8x192xf32> to vector<8x64xf32>
    %42 = vector.extract_strided_slice %37 {offsets = [0, 128], sizes = [8, 64], strides = [1, 1]} : vector<8x192xf32> to vector<8x64xf32>
    %43 = arith.mulf %41, %26 : vector<8x64xf32>
    %44 = arith.mulf %40, %39 : vector<8x64xf32>
    %45 = arith.addf %43, %44 : vector<8x64xf32>
    %46 = math.tanh %45 : vector<8x64xf32>
    %47 = arith.mulf %42, %46 : vector<8x64xf32>
    %c16 = arith.constant 16 : index
    %c0_18 = arith.constant 0 : index
    %48 = vector.load %arg10[%c16, %c0_18] : memref<128x256xf32, #tpu.memory_space<vmem>>, vector<8x256xf32>
    %cst_19 = arith.constant dense<0.000000e+00> : vector<8x256xf32>
    %49 = tpu.matmul %47, %7, %cst_19 {dimension_numbers = #tpu.dot_dimension_numbers<[1], [0], [0], [1], [0, 0, 1, 1], [], []>} : vector<8x64xf32>, vector<64x256xf32>, vector<8x256xf32> -> vector<8x256xf32>
    %50 = arith.addf %48, %49 : vector<8x256xf32>
    %51 = vector.extract_strided_slice %50 {offsets = [0, 0], sizes = [8, 192], strides = [1, 1]} : vector<8x256xf32> to vector<8x192xf32>
    %52 = arith.negf %51 : vector<8x192xf32>
    %53 = math.exp %52 : vector<8x192xf32>
    %cst_20 = arith.constant 1.000000e+00 : f32
    %54 = vector.broadcast %cst_20 : f32 to vector<8x192xf32>
    %55 = arith.addf %54, %53 : vector<8x192xf32>
    %56 = arith.divf %54, %55 : vector<8x192xf32>
    %57 = vector.extract_strided_slice %50 {offsets = [0, 192], sizes = [8, 64], strides = [1, 1]} : vector<8x256xf32> to vector<8x64xf32>
    %58 = math.tanh %57 : vector<8x64xf32>
    %59 = vector.extract_strided_slice %56 {offsets = [0, 0], sizes = [8, 64], strides = [1, 1]} : vector<8x192xf32> to vector<8x64xf32>
    %60 = vector.extract_strided_slice %56 {offsets = [0, 64], sizes = [8, 64], strides = [1, 1]} : vector<8x192xf32> to vector<8x64xf32>
    %61 = vector.extract_strided_slice %56 {offsets = [0, 128], sizes = [8, 64], strides = [1, 1]} : vector<8x192xf32> to vector<8x64xf32>
    %62 = arith.mulf %60, %45 : vector<8x64xf32>
    %63 = arith.mulf %59, %58 : vector<8x64xf32>
    %64 = arith.addf %62, %63 : vector<8x64xf32>
    %65 = math.tanh %64 : vector<8x64xf32>
    %66 = arith.mulf %61, %65 : vector<8x64xf32>
    %c24 = arith.constant 24 : index
    %c0_21 = arith.constant 0 : index
    %67 = vector.load %arg10[%c24, %c0_21] : memref<128x256xf32, #tpu.memory_space<vmem>>, vector<8x256xf32>
    %cst_22 = arith.constant dense<0.000000e+00> : vector<8x256xf32>
    %68 = tpu.matmul %66, %7, %cst_22 {dimension_numbers = #tpu.dot_dimension_numbers<[1], [0], [0], [1], [0, 0, 1, 1], [], []>} : vector<8x64xf32>, vector<64x256xf32>, vector<8x256xf32> -> vector<8x256xf32>
    %69 = arith.addf %67, %68 : vector<8x256xf32>
    %70 = vector.extract_strided_slice %69 {offsets = [0, 0], sizes = [8, 192], strides = [1, 1]} : vector<8x256xf32> to vector<8x192xf32>
    %71 = arith.negf %70 : vector<8x192xf32>
    %72 = math.exp %71 : vector<8x192xf32>
    %cst_23 = arith.constant 1.000000e+00 : f32
    %73 = vector.broadcast %cst_23 : f32 to vector<8x192xf32>
    %74 = arith.addf %73, %72 : vector<8x192xf32>
    %75 = arith.divf %73, %74 : vector<8x192xf32>
    %76 = vector.extract_strided_slice %69 {offsets = [0, 192], sizes = [8, 64], strides = [1, 1]} : vector<8x256xf32> to vector<8x64xf32>
    %77 = math.tanh %76 : vector<8x64xf32>
    %78 = vector.extract_strided_slice %75 {offsets = [0, 0], sizes = [8, 64], strides = [1, 1]} : vector<8x192xf32> to vector<8x64xf32>
    %79 = vector.extract_strided_slice %75 {offsets = [0, 64], sizes = [8, 64], strides = [1, 1]} : vector<8x192xf32> to vector<8x64xf32>
    %80 = vector.extract_strided_slice %75 {offsets = [0, 128], sizes = [8, 64], strides = [1, 1]} : vector<8x192xf32> to vector<8x64xf32>
    %81 = arith.mulf %79, %64 : vector<8x64xf32>
    %82 = arith.mulf %78, %77 : vector<8x64xf32>
    %83 = arith.addf %81, %82 : vector<8x64xf32>
    %84 = math.tanh %83 : vector<8x64xf32>
    %85 = arith.mulf %80, %84 : vector<8x64xf32>
    %c32 = arith.constant 32 : index
    %c0_24 = arith.constant 0 : index
    %86 = vector.load %arg10[%c32, %c0_24] : memref<128x256xf32, #tpu.memory_space<vmem>>, vector<8x256xf32>
    %cst_25 = arith.constant dense<0.000000e+00> : vector<8x256xf32>
    %87 = tpu.matmul %85, %7, %cst_25 {dimension_numbers = #tpu.dot_dimension_numbers<[1], [0], [0], [1], [0, 0, 1, 1], [], []>} : vector<8x64xf32>, vector<64x256xf32>, vector<8x256xf32> -> vector<8x256xf32>
    %88 = arith.addf %86, %87 : vector<8x256xf32>
    %89 = vector.extract_strided_slice %88 {offsets = [0, 0], sizes = [8, 192], strides = [1, 1]} : vector<8x256xf32> to vector<8x192xf32>
    %90 = arith.negf %89 : vector<8x192xf32>
    %91 = math.exp %90 : vector<8x192xf32>
    %cst_26 = arith.constant 1.000000e+00 : f32
    %92 = vector.broadcast %cst_26 : f32 to vector<8x192xf32>
    %93 = arith.addf %92, %91 : vector<8x192xf32>
    %94 = arith.divf %92, %93 : vector<8x192xf32>
    %95 = vector.extract_strided_slice %88 {offsets = [0, 192], sizes = [8, 64], strides = [1, 1]} : vector<8x256xf32> to vector<8x64xf32>
    %96 = math.tanh %95 : vector<8x64xf32>
    %97 = vector.extract_strided_slice %94 {offsets = [0, 0], sizes = [8, 64], strides = [1, 1]} : vector<8x192xf32> to vector<8x64xf32>
    %98 = vector.extract_strided_slice %94 {offsets = [0, 64], sizes = [8, 64], strides = [1, 1]} : vector<8x192xf32> to vector<8x64xf32>
    %99 = vector.extract_strided_slice %94 {offsets = [0, 128], sizes = [8, 64], strides = [1, 1]} : vector<8x192xf32> to vector<8x64xf32>
    %100 = arith.mulf %98, %83 : vector<8x64xf32>
    %101 = arith.mulf %97, %96 : vector<8x64xf32>
    %102 = arith.addf %100, %101 : vector<8x64xf32>
    %103 = math.tanh %102 : vector<8x64xf32>
    %104 = arith.mulf %99, %103 : vector<8x64xf32>
    %c40 = arith.constant 40 : index
    %c0_27 = arith.constant 0 : index
    %105 = vector.load %arg10[%c40, %c0_27] : memref<128x256xf32, #tpu.memory_space<vmem>>, vector<8x256xf32>
    %cst_28 = arith.constant dense<0.000000e+00> : vector<8x256xf32>
    %106 = tpu.matmul %104, %7, %cst_28 {dimension_numbers = #tpu.dot_dimension_numbers<[1], [0], [0], [1], [0, 0, 1, 1], [], []>} : vector<8x64xf32>, vector<64x256xf32>, vector<8x256xf32> -> vector<8x256xf32>
    %107 = arith.addf %105, %106 : vector<8x256xf32>
    %108 = vector.extract_strided_slice %107 {offsets = [0, 0], sizes = [8, 192], strides = [1, 1]} : vector<8x256xf32> to vector<8x192xf32>
    %109 = arith.negf %108 : vector<8x192xf32>
    %110 = math.exp %109 : vector<8x192xf32>
    %cst_29 = arith.constant 1.000000e+00 : f32
    %111 = vector.broadcast %cst_29 : f32 to vector<8x192xf32>
    %112 = arith.addf %111, %110 : vector<8x192xf32>
    %113 = arith.divf %111, %112 : vector<8x192xf32>
    %114 = vector.extract_strided_slice %107 {offsets = [0, 192], sizes = [8, 64], strides = [1, 1]} : vector<8x256xf32> to vector<8x64xf32>
    %115 = math.tanh %114 : vector<8x64xf32>
    %116 = vector.extract_strided_slice %113 {offsets = [0, 0], sizes = [8, 64], strides = [1, 1]} : vector<8x192xf32> to vector<8x64xf32>
    %117 = vector.extract_strided_slice %113 {offsets = [0, 64], sizes = [8, 64], strides = [1, 1]} : vector<8x192xf32> to vector<8x64xf32>
    %118 = vector.extract_strided_slice %113 {offsets = [0, 128], sizes = [8, 64], strides = [1, 1]} : vector<8x192xf32> to vector<8x64xf32>
    %119 = arith.mulf %117, %102 : vector<8x64xf32>
    %120 = arith.mulf %116, %115 : vector<8x64xf32>
    %121 = arith.addf %119, %120 : vector<8x64xf32>
    %122 = math.tanh %121 : vector<8x64xf32>
    %123 = arith.mulf %118, %122 : vector<8x64xf32>
    %c48 = arith.constant 48 : index
    %c0_30 = arith.constant 0 : index
    %124 = vector.load %arg10[%c48, %c0_30] : memref<128x256xf32, #tpu.memory_space<vmem>>, vector<8x256xf32>
    %cst_31 = arith.constant dense<0.000000e+00> : vector<8x256xf32>
    %125 = tpu.matmul %123, %7, %cst_31 {dimension_numbers = #tpu.dot_dimension_numbers<[1], [0], [0], [1], [0, 0, 1, 1], [], []>} : vector<8x64xf32>, vector<64x256xf32>, vector<8x256xf32> -> vector<8x256xf32>
    %126 = arith.addf %124, %125 : vector<8x256xf32>
    %127 = vector.extract_strided_slice %126 {offsets = [0, 0], sizes = [8, 192], strides = [1, 1]} : vector<8x256xf32> to vector<8x192xf32>
    %128 = arith.negf %127 : vector<8x192xf32>
    %129 = math.exp %128 : vector<8x192xf32>
    %cst_32 = arith.constant 1.000000e+00 : f32
    %130 = vector.broadcast %cst_32 : f32 to vector<8x192xf32>
    %131 = arith.addf %130, %129 : vector<8x192xf32>
    %132 = arith.divf %130, %131 : vector<8x192xf32>
    %133 = vector.extract_strided_slice %126 {offsets = [0, 192], sizes = [8, 64], strides = [1, 1]} : vector<8x256xf32> to vector<8x64xf32>
    %134 = math.tanh %133 : vector<8x64xf32>
    %135 = vector.extract_strided_slice %132 {offsets = [0, 0], sizes = [8, 64], strides = [1, 1]} : vector<8x192xf32> to vector<8x64xf32>
    %136 = vector.extract_strided_slice %132 {offsets = [0, 64], sizes = [8, 64], strides = [1, 1]} : vector<8x192xf32> to vector<8x64xf32>
    %137 = vector.extract_strided_slice %132 {offsets = [0, 128], sizes = [8, 64], strides = [1, 1]} : vector<8x192xf32> to vector<8x64xf32>
    %138 = arith.mulf %136, %121 : vector<8x64xf32>
    %139 = arith.mulf %135, %134 : vector<8x64xf32>
    %140 = arith.addf %138, %139 : vector<8x64xf32>
    %141 = math.tanh %140 : vector<8x64xf32>
    %142 = arith.mulf %137, %141 : vector<8x64xf32>
    %c56 = arith.constant 56 : index
    %c0_33 = arith.constant 0 : index
    %143 = vector.load %arg10[%c56, %c0_33] : memref<128x256xf32, #tpu.memory_space<vmem>>, vector<8x256xf32>
    %cst_34 = arith.constant dense<0.000000e+00> : vector<8x256xf32>
    %144 = tpu.matmul %142, %7, %cst_34 {dimension_numbers = #tpu.dot_dimension_numbers<[1], [0], [0], [1], [0, 0, 1, 1], [], []>} : vector<8x64xf32>, vector<64x256xf32>, vector<8x256xf32> -> vector<8x256xf32>
    %145 = arith.addf %143, %144 : vector<8x256xf32>
    %146 = vector.extract_strided_slice %145 {offsets = [0, 0], sizes = [8, 192], strides = [1, 1]} : vector<8x256xf32> to vector<8x192xf32>
    %147 = arith.negf %146 : vector<8x192xf32>
    %148 = math.exp %147 : vector<8x192xf32>
    %cst_35 = arith.constant 1.000000e+00 : f32
    %149 = vector.broadcast %cst_35 : f32 to vector<8x192xf32>
    %150 = arith.addf %149, %148 : vector<8x192xf32>
    %151 = arith.divf %149, %150 : vector<8x192xf32>
    %152 = vector.extract_strided_slice %145 {offsets = [0, 192], sizes = [8, 64], strides = [1, 1]} : vector<8x256xf32> to vector<8x64xf32>
    %153 = math.tanh %152 : vector<8x64xf32>
    %154 = vector.extract_strided_slice %151 {offsets = [0, 0], sizes = [8, 64], strides = [1, 1]} : vector<8x192xf32> to vector<8x64xf32>
    %155 = vector.extract_strided_slice %151 {offsets = [0, 64], sizes = [8, 64], strides = [1, 1]} : vector<8x192xf32> to vector<8x64xf32>
    %156 = vector.extract_strided_slice %151 {offsets = [0, 128], sizes = [8, 64], strides = [1, 1]} : vector<8x192xf32> to vector<8x64xf32>
    %157 = arith.mulf %155, %140 : vector<8x64xf32>
    %158 = arith.mulf %154, %153 : vector<8x64xf32>
    %159 = arith.addf %157, %158 : vector<8x64xf32>
    %160 = math.tanh %159 : vector<8x64xf32>
    %161 = arith.mulf %156, %160 : vector<8x64xf32>
    %c64 = arith.constant 64 : index
    %c0_36 = arith.constant 0 : index
    %162 = vector.load %arg10[%c64, %c0_36] : memref<128x256xf32, #tpu.memory_space<vmem>>, vector<8x256xf32>
    %cst_37 = arith.constant dense<0.000000e+00> : vector<8x256xf32>
    %163 = tpu.matmul %161, %7, %cst_37 {dimension_numbers = #tpu.dot_dimension_numbers<[1], [0], [0], [1], [0, 0, 1, 1], [], []>} : vector<8x64xf32>, vector<64x256xf32>, vector<8x256xf32> -> vector<8x256xf32>
    %164 = arith.addf %162, %163 : vector<8x256xf32>
    %165 = vector.extract_strided_slice %164 {offsets = [0, 0], sizes = [8, 192], strides = [1, 1]} : vector<8x256xf32> to vector<8x192xf32>
    %166 = arith.negf %165 : vector<8x192xf32>
    %167 = math.exp %166 : vector<8x192xf32>
    %cst_38 = arith.constant 1.000000e+00 : f32
    %168 = vector.broadcast %cst_38 : f32 to vector<8x192xf32>
    %169 = arith.addf %168, %167 : vector<8x192xf32>
    %170 = arith.divf %168, %169 : vector<8x192xf32>
    %171 = vector.extract_strided_slice %164 {offsets = [0, 192], sizes = [8, 64], strides = [1, 1]} : vector<8x256xf32> to vector<8x64xf32>
    %172 = math.tanh %171 : vector<8x64xf32>
    %173 = vector.extract_strided_slice %170 {offsets = [0, 0], sizes = [8, 64], strides = [1, 1]} : vector<8x192xf32> to vector<8x64xf32>
    %174 = vector.extract_strided_slice %170 {offsets = [0, 64], sizes = [8, 64], strides = [1, 1]} : vector<8x192xf32> to vector<8x64xf32>
    %175 = vector.extract_strided_slice %170 {offsets = [0, 128], sizes = [8, 64], strides = [1, 1]} : vector<8x192xf32> to vector<8x64xf32>
    %176 = arith.mulf %174, %159 : vector<8x64xf32>
    %177 = arith.mulf %173, %172 : vector<8x64xf32>
    %178 = arith.addf %176, %177 : vector<8x64xf32>
    %179 = math.tanh %178 : vector<8x64xf32>
    %180 = arith.mulf %175, %179 : vector<8x64xf32>
    %c72 = arith.constant 72 : index
    %c0_39 = arith.constant 0 : index
    %181 = vector.load %arg10[%c72, %c0_39] : memref<128x256xf32, #tpu.memory_space<vmem>>, vector<8x256xf32>
    %cst_40 = arith.constant dense<0.000000e+00> : vector<8x256xf32>
    %182 = tpu.matmul %180, %7, %cst_40 {dimension_numbers = #tpu.dot_dimension_numbers<[1], [0], [0], [1], [0, 0, 1, 1], [], []>} : vector<8x64xf32>, vector<64x256xf32>, vector<8x256xf32> -> vector<8x256xf32>
    %183 = arith.addf %181, %182 : vector<8x256xf32>
    %184 = vector.extract_strided_slice %183 {offsets = [0, 0], sizes = [8, 192], strides = [1, 1]} : vector<8x256xf32> to vector<8x192xf32>
    %185 = arith.negf %184 : vector<8x192xf32>
    %186 = math.exp %185 : vector<8x192xf32>
    %cst_41 = arith.constant 1.000000e+00 : f32
    %187 = vector.broadcast %cst_41 : f32 to vector<8x192xf32>
    %188 = arith.addf %187, %186 : vector<8x192xf32>
    %189 = arith.divf %187, %188 : vector<8x192xf32>
    %190 = vector.extract_strided_slice %183 {offsets = [0, 192], sizes = [8, 64], strides = [1, 1]} : vector<8x256xf32> to vector<8x64xf32>
    %191 = math.tanh %190 : vector<8x64xf32>
    %192 = vector.extract_strided_slice %189 {offsets = [0, 0], sizes = [8, 64], strides = [1, 1]} : vector<8x192xf32> to vector<8x64xf32>
    %193 = vector.extract_strided_slice %189 {offsets = [0, 64], sizes = [8, 64], strides = [1, 1]} : vector<8x192xf32> to vector<8x64xf32>
    %194 = vector.extract_strided_slice %189 {offsets = [0, 128], sizes = [8, 64], strides = [1, 1]} : vector<8x192xf32> to vector<8x64xf32>
    %195 = arith.mulf %193, %178 : vector<8x64xf32>
    %196 = arith.mulf %192, %191 : vector<8x64xf32>
    %197 = arith.addf %195, %196 : vector<8x64xf32>
    %198 = math.tanh %197 : vector<8x64xf32>
    %199 = arith.mulf %194, %198 : vector<8x64xf32>
    %c80 = arith.constant 80 : index
    %c0_42 = arith.constant 0 : index
    %200 = vector.load %arg10[%c80, %c0_42] : memref<128x256xf32, #tpu.memory_space<vmem>>, vector<8x256xf32>
    %cst_43 = arith.constant dense<0.000000e+00> : vector<8x256xf32>
    %201 = tpu.matmul %199, %7, %cst_43 {dimension_numbers = #tpu.dot_dimension_numbers<[1], [0], [0], [1], [0, 0, 1, 1], [], []>} : vector<8x64xf32>, vector<64x256xf32>, vector<8x256xf32> -> vector<8x256xf32>
    %202 = arith.addf %200, %201 : vector<8x256xf32>
    %203 = vector.extract_strided_slice %202 {offsets = [0, 0], sizes = [8, 192], strides = [1, 1]} : vector<8x256xf32> to vector<8x192xf32>
    %204 = arith.negf %203 : vector<8x192xf32>
    %205 = math.exp %204 : vector<8x192xf32>
    %cst_44 = arith.constant 1.000000e+00 : f32
    %206 = vector.broadcast %cst_44 : f32 to vector<8x192xf32>
    %207 = arith.addf %206, %205 : vector<8x192xf32>
    %208 = arith.divf %206, %207 : vector<8x192xf32>
    %209 = vector.extract_strided_slice %202 {offsets = [0, 192], sizes = [8, 64], strides = [1, 1]} : vector<8x256xf32> to vector<8x64xf32>
    %210 = math.tanh %209 : vector<8x64xf32>
    %211 = vector.extract_strided_slice %208 {offsets = [0, 0], sizes = [8, 64], strides = [1, 1]} : vector<8x192xf32> to vector<8x64xf32>
    %212 = vector.extract_strided_slice %208 {offsets = [0, 64], sizes = [8, 64], strides = [1, 1]} : vector<8x192xf32> to vector<8x64xf32>
    %213 = vector.extract_strided_slice %208 {offsets = [0, 128], sizes = [8, 64], strides = [1, 1]} : vector<8x192xf32> to vector<8x64xf32>
    %214 = arith.mulf %212, %197 : vector<8x64xf32>
    %215 = arith.mulf %211, %210 : vector<8x64xf32>
    %216 = arith.addf %214, %215 : vector<8x64xf32>
    %217 = math.tanh %216 : vector<8x64xf32>
    %218 = arith.mulf %213, %217 : vector<8x64xf32>
    %c88 = arith.constant 88 : index
    %c0_45 = arith.constant 0 : index
    %219 = vector.load %arg10[%c88, %c0_45] : memref<128x256xf32, #tpu.memory_space<vmem>>, vector<8x256xf32>
    %cst_46 = arith.constant dense<0.000000e+00> : vector<8x256xf32>
    %220 = tpu.matmul %218, %7, %cst_46 {dimension_numbers = #tpu.dot_dimension_numbers<[1], [0], [0], [1], [0, 0, 1, 1], [], []>} : vector<8x64xf32>, vector<64x256xf32>, vector<8x256xf32> -> vector<8x256xf32>
    %221 = arith.addf %219, %220 : vector<8x256xf32>
    %222 = vector.extract_strided_slice %221 {offsets = [0, 0], sizes = [8, 192], strides = [1, 1]} : vector<8x256xf32> to vector<8x192xf32>
    %223 = arith.negf %222 : vector<8x192xf32>
    %224 = math.exp %223 : vector<8x192xf32>
    %cst_47 = arith.constant 1.000000e+00 : f32
    %225 = vector.broadcast %cst_47 : f32 to vector<8x192xf32>
    %226 = arith.addf %225, %224 : vector<8x192xf32>
    %227 = arith.divf %225, %226 : vector<8x192xf32>
    %228 = vector.extract_strided_slice %221 {offsets = [0, 192], sizes = [8, 64], strides = [1, 1]} : vector<8x256xf32> to vector<8x64xf32>
    %229 = math.tanh %228 : vector<8x64xf32>
    %230 = vector.extract_strided_slice %227 {offsets = [0, 0], sizes = [8, 64], strides = [1, 1]} : vector<8x192xf32> to vector<8x64xf32>
    %231 = vector.extract_strided_slice %227 {offsets = [0, 64], sizes = [8, 64], strides = [1, 1]} : vector<8x192xf32> to vector<8x64xf32>
    %232 = vector.extract_strided_slice %227 {offsets = [0, 128], sizes = [8, 64], strides = [1, 1]} : vector<8x192xf32> to vector<8x64xf32>
    %233 = arith.mulf %231, %216 : vector<8x64xf32>
    %234 = arith.mulf %230, %229 : vector<8x64xf32>
    %235 = arith.addf %233, %234 : vector<8x64xf32>
    %236 = math.tanh %235 : vector<8x64xf32>
    %237 = arith.mulf %232, %236 : vector<8x64xf32>
    %c96 = arith.constant 96 : index
    %c0_48 = arith.constant 0 : index
    %238 = vector.load %arg10[%c96, %c0_48] : memref<128x256xf32, #tpu.memory_space<vmem>>, vector<8x256xf32>
    %cst_49 = arith.constant dense<0.000000e+00> : vector<8x256xf32>
    %239 = tpu.matmul %237, %7, %cst_49 {dimension_numbers = #tpu.dot_dimension_numbers<[1], [0], [0], [1], [0, 0, 1, 1], [], []>} : vector<8x64xf32>, vector<64x256xf32>, vector<8x256xf32> -> vector<8x256xf32>
    %240 = arith.addf %238, %239 : vector<8x256xf32>
    %241 = vector.extract_strided_slice %240 {offsets = [0, 0], sizes = [8, 192], strides = [1, 1]} : vector<8x256xf32> to vector<8x192xf32>
    %242 = arith.negf %241 : vector<8x192xf32>
    %243 = math.exp %242 : vector<8x192xf32>
    %cst_50 = arith.constant 1.000000e+00 : f32
    %244 = vector.broadcast %cst_50 : f32 to vector<8x192xf32>
    %245 = arith.addf %244, %243 : vector<8x192xf32>
    %246 = arith.divf %244, %245 : vector<8x192xf32>
    %247 = vector.extract_strided_slice %240 {offsets = [0, 192], sizes = [8, 64], strides = [1, 1]} : vector<8x256xf32> to vector<8x64xf32>
    %248 = math.tanh %247 : vector<8x64xf32>
    %249 = vector.extract_strided_slice %246 {offsets = [0, 0], sizes = [8, 64], strides = [1, 1]} : vector<8x192xf32> to vector<8x64xf32>
    %250 = vector.extract_strided_slice %246 {offsets = [0, 64], sizes = [8, 64], strides = [1, 1]} : vector<8x192xf32> to vector<8x64xf32>
    %251 = vector.extract_strided_slice %246 {offsets = [0, 128], sizes = [8, 64], strides = [1, 1]} : vector<8x192xf32> to vector<8x64xf32>
    %252 = arith.mulf %250, %235 : vector<8x64xf32>
    %253 = arith.mulf %249, %248 : vector<8x64xf32>
    %254 = arith.addf %252, %253 : vector<8x64xf32>
    %255 = math.tanh %254 : vector<8x64xf32>
    %256 = arith.mulf %251, %255 : vector<8x64xf32>
    %c104 = arith.constant 104 : index
    %c0_51 = arith.constant 0 : index
    %257 = vector.load %arg10[%c104, %c0_51] : memref<128x256xf32, #tpu.memory_space<vmem>>, vector<8x256xf32>
    %cst_52 = arith.constant dense<0.000000e+00> : vector<8x256xf32>
    %258 = tpu.matmul %256, %7, %cst_52 {dimension_numbers = #tpu.dot_dimension_numbers<[1], [0], [0], [1], [0, 0, 1, 1], [], []>} : vector<8x64xf32>, vector<64x256xf32>, vector<8x256xf32> -> vector<8x256xf32>
    %259 = arith.addf %257, %258 : vector<8x256xf32>
    %260 = vector.extract_strided_slice %259 {offsets = [0, 0], sizes = [8, 192], strides = [1, 1]} : vector<8x256xf32> to vector<8x192xf32>
    %261 = arith.negf %260 : vector<8x192xf32>
    %262 = math.exp %261 : vector<8x192xf32>
    %cst_53 = arith.constant 1.000000e+00 : f32
    %263 = vector.broadcast %cst_53 : f32 to vector<8x192xf32>
    %264 = arith.addf %263, %262 : vector<8x192xf32>
    %265 = arith.divf %263, %264 : vector<8x192xf32>
    %266 = vector.extract_strided_slice %259 {offsets = [0, 192], sizes = [8, 64], strides = [1, 1]} : vector<8x256xf32> to vector<8x64xf32>
    %267 = math.tanh %266 : vector<8x64xf32>
    %268 = vector.extract_strided_slice %265 {offsets = [0, 0], sizes = [8, 64], strides = [1, 1]} : vector<8x192xf32> to vector<8x64xf32>
    %269 = vector.extract_strided_slice %265 {offsets = [0, 64], sizes = [8, 64], strides = [1, 1]} : vector<8x192xf32> to vector<8x64xf32>
    %270 = vector.extract_strided_slice %265 {offsets = [0, 128], sizes = [8, 64], strides = [1, 1]} : vector<8x192xf32> to vector<8x64xf32>
    %271 = arith.mulf %269, %254 : vector<8x64xf32>
    %272 = arith.mulf %268, %267 : vector<8x64xf32>
    %273 = arith.addf %271, %272 : vector<8x64xf32>
    %274 = math.tanh %273 : vector<8x64xf32>
    %275 = arith.mulf %270, %274 : vector<8x64xf32>
    %c112 = arith.constant 112 : index
    %c0_54 = arith.constant 0 : index
    %276 = vector.load %arg10[%c112, %c0_54] : memref<128x256xf32, #tpu.memory_space<vmem>>, vector<8x256xf32>
    %cst_55 = arith.constant dense<0.000000e+00> : vector<8x256xf32>
    %277 = tpu.matmul %275, %7, %cst_55 {dimension_numbers = #tpu.dot_dimension_numbers<[1], [0], [0], [1], [0, 0, 1, 1], [], []>} : vector<8x64xf32>, vector<64x256xf32>, vector<8x256xf32> -> vector<8x256xf32>
    %278 = arith.addf %276, %277 : vector<8x256xf32>
    %279 = vector.extract_strided_slice %278 {offsets = [0, 0], sizes = [8, 192], strides = [1, 1]} : vector<8x256xf32> to vector<8x192xf32>
    %280 = arith.negf %279 : vector<8x192xf32>
    %281 = math.exp %280 : vector<8x192xf32>
    %cst_56 = arith.constant 1.000000e+00 : f32
    %282 = vector.broadcast %cst_56 : f32 to vector<8x192xf32>
    %283 = arith.addf %282, %281 : vector<8x192xf32>
    %284 = arith.divf %282, %283 : vector<8x192xf32>
    %285 = vector.extract_strided_slice %278 {offsets = [0, 192], sizes = [8, 64], strides = [1, 1]} : vector<8x256xf32> to vector<8x64xf32>
    %286 = math.tanh %285 : vector<8x64xf32>
    %287 = vector.extract_strided_slice %284 {offsets = [0, 0], sizes = [8, 64], strides = [1, 1]} : vector<8x192xf32> to vector<8x64xf32>
    %288 = vector.extract_strided_slice %284 {offsets = [0, 64], sizes = [8, 64], strides = [1, 1]} : vector<8x192xf32> to vector<8x64xf32>
    %289 = vector.extract_strided_slice %284 {offsets = [0, 128], sizes = [8, 64], strides = [1, 1]} : vector<8x192xf32> to vector<8x64xf32>
    %290 = arith.mulf %288, %273 : vector<8x64xf32>
    %291 = arith.mulf %287, %286 : vector<8x64xf32>
    %292 = arith.addf %290, %291 : vector<8x64xf32>
    %293 = math.tanh %292 : vector<8x64xf32>
    %294 = arith.mulf %289, %293 : vector<8x64xf32>
    %c120 = arith.constant 120 : index
    %c0_57 = arith.constant 0 : index
    %295 = vector.load %arg10[%c120, %c0_57] : memref<128x256xf32, #tpu.memory_space<vmem>>, vector<8x256xf32>
    %cst_58 = arith.constant dense<0.000000e+00> : vector<8x256xf32>
    %296 = tpu.matmul %294, %7, %cst_58 {dimension_numbers = #tpu.dot_dimension_numbers<[1], [0], [0], [1], [0, 0, 1, 1], [], []>} : vector<8x64xf32>, vector<64x256xf32>, vector<8x256xf32> -> vector<8x256xf32>
    %297 = arith.addf %295, %296 : vector<8x256xf32>
    %298 = vector.extract_strided_slice %297 {offsets = [0, 0], sizes = [8, 192], strides = [1, 1]} : vector<8x256xf32> to vector<8x192xf32>
    %299 = arith.negf %298 : vector<8x192xf32>
    %300 = math.exp %299 : vector<8x192xf32>
    %cst_59 = arith.constant 1.000000e+00 : f32
    %301 = vector.broadcast %cst_59 : f32 to vector<8x192xf32>
    %302 = arith.addf %301, %300 : vector<8x192xf32>
    %303 = arith.divf %301, %302 : vector<8x192xf32>
    %304 = vector.extract_strided_slice %297 {offsets = [0, 192], sizes = [8, 64], strides = [1, 1]} : vector<8x256xf32> to vector<8x64xf32>
    %305 = math.tanh %304 : vector<8x64xf32>
    %306 = vector.extract_strided_slice %303 {offsets = [0, 0], sizes = [8, 64], strides = [1, 1]} : vector<8x192xf32> to vector<8x64xf32>
    %307 = vector.extract_strided_slice %303 {offsets = [0, 64], sizes = [8, 64], strides = [1, 1]} : vector<8x192xf32> to vector<8x64xf32>
    %308 = vector.extract_strided_slice %303 {offsets = [0, 128], sizes = [8, 64], strides = [1, 1]} : vector<8x192xf32> to vector<8x64xf32>
    %309 = arith.mulf %307, %292 : vector<8x64xf32>
    %310 = arith.mulf %306, %305 : vector<8x64xf32>
    %311 = arith.addf %309, %310 : vector<8x64xf32>
    %312 = math.tanh %311 : vector<8x64xf32>
    %313 = arith.mulf %308, %312 : vector<8x64xf32>
    %c120_60 = arith.constant 120 : index
    %c0_61 = arith.constant 0 : index
    %314 = vector.load %arg0[%c120_60, %c0_61] : memref<128x32xf32, #tpu.memory_space<vmem>>, vector<8x32xf32>
    %c0_62 = arith.constant 0 : index
    %c0_63 = arith.constant 0 : index
    %315 = vector.load %arg4[%c0_62, %c0_63] : memref<32x256xf32, #tpu.memory_space<vmem>>, vector<32x256xf32>
    %cst_64 = arith.constant dense<0.000000e+00> : vector<8x256xf32>
    %316 = tpu.matmul %314, %315, %cst_64 {dimension_numbers = #tpu.dot_dimension_numbers<[1], [0], [0], [1], [0, 0, 1, 1], [], []>} : vector<8x32xf32>, vector<32x256xf32>, vector<8x256xf32> -> vector<8x256xf32>
    %c0_65 = arith.constant 0 : index
    %c0_66 = arith.constant 0 : index
    %317 = vector.load %arg5[%c0_65, %c0_66] : memref<1x256xf32, #tpu.memory_space<vmem>>, vector<1x256xf32>
    %318 = vector.broadcast %317 : vector<1x256xf32> to vector<8x256xf32>
    %319 = arith.addf %316, %318 : vector<8x256xf32>
    %320 = vector.extract_strided_slice %319 {offsets = [0, 0], sizes = [8, 192], strides = [1, 1]} : vector<8x256xf32> to vector<8x192xf32>
    %321 = arith.negf %320 : vector<8x192xf32>
    %322 = math.exp %321 : vector<8x192xf32>
    %cst_67 = arith.constant 1.000000e+00 : f32
    %323 = vector.broadcast %cst_67 : f32 to vector<8x192xf32>
    %324 = arith.addf %323, %322 : vector<8x192xf32>
    %325 = arith.divf %323, %324 : vector<8x192xf32>
    %326 = vector.extract_strided_slice %319 {offsets = [0, 192], sizes = [8, 64], strides = [1, 1]} : vector<8x256xf32> to vector<8x64xf32>
    %327 = math.tanh %326 : vector<8x64xf32>
    %328 = vector.extract_strided_slice %325 {offsets = [0, 128], sizes = [8, 64], strides = [1, 1]} : vector<8x192xf32> to vector<8x64xf32>
    %329 = vector.extract_strided_slice %325 {offsets = [0, 0], sizes = [8, 64], strides = [1, 1]} : vector<8x192xf32> to vector<8x64xf32>
    %330 = arith.mulf %329, %327 : vector<8x64xf32>
    %331 = math.tanh %330 : vector<8x64xf32>
    %332 = arith.mulf %328, %331 : vector<8x64xf32>
    %c0_68 = arith.constant 0 : index
    %c0_69 = arith.constant 0 : index
    %333 = vector.load %arg6[%c0_68, %c0_69] : memref<64x128xf32, #tpu.memory_space<vmem>>, vector<64x128xf32>
    %cst_70 = arith.constant dense<0.000000e+00> : vector<8x128xf32>
    %334 = tpu.matmul %313, %333, %cst_70 {dimension_numbers = #tpu.dot_dimension_numbers<[1], [0], [0], [1], [0, 0, 1, 1], [], []>} : vector<8x64xf32>, vector<64x128xf32>, vector<8x128xf32> -> vector<8x128xf32>
    %c0_71 = arith.constant 0 : index
    %c0_72 = arith.constant 0 : index
    %335 = vector.load %arg7[%c0_71, %c0_72] : memref<64x128xf32, #tpu.memory_space<vmem>>, vector<64x128xf32>
    %cst_73 = arith.constant dense<0.000000e+00> : vector<8x128xf32>
    %336 = tpu.matmul %332, %335, %cst_73 {dimension_numbers = #tpu.dot_dimension_numbers<[1], [0], [0], [1], [0, 0, 1, 1], [], []>} : vector<8x64xf32>, vector<64x128xf32>, vector<8x128xf32> -> vector<8x128xf32>
    %337 = arith.addf %334, %336 : vector<8x128xf32>
    %c0_74 = arith.constant 0 : index
    %c0_75 = arith.constant 0 : index
    %338 = vector.load %arg8[%c0_74, %c0_75] : memref<1x128xf32, #tpu.memory_space<vmem>>, vector<1x128xf32>
    %339 = vector.broadcast %338 : vector<1x128xf32> to vector<8x128xf32>
    %340 = arith.addf %337, %339 : vector<8x128xf32>
    %cst_76 = arith.constant dense<0xFF800000> : vector<8xf32>
    %341 = vector.multi_reduction <maximumf>, %340, %cst_76 [1] : vector<8x128xf32> to vector<8xf32>
    %342 = vector.shape_cast %341 : vector<8xf32> to vector<8x1xf32>
    %343 = vector.broadcast %342 : vector<8x1xf32> to vector<8x128xf32>
    %344 = arith.subf %340, %343 : vector<8x128xf32>
    %345 = math.exp %344 : vector<8x128xf32>
    %cst_77 = arith.constant dense<0.000000e+00> : vector<8xf32>
    %346 = vector.multi_reduction <add>, %345, %cst_77 [1] : vector<8x128xf32> to vector<8xf32>
    %347 = vector.shape_cast %346 : vector<8xf32> to vector<8x1xf32>
    %348 = vector.broadcast %347 : vector<8x1xf32> to vector<8x128xf32>
    %349 = arith.divf %345, %348 : vector<8x128xf32>
    %c0_78 = arith.constant 0 : index
    %c0_79 = arith.constant 0 : index
    %350 = vector.load %arg9[%c0_78, %c0_79] : memref<8x128xf32, #tpu.memory_space<vmem>>, vector<8x128xf32>
    tpu.vector_store %arg9[%c0_78, %c0_79], %349 {strides = array<i32>} : memref<8x128xf32, #tpu.memory_space<vmem>>, vector<8x128xf32>,
    return
  }
}

</mosaic_0001>

<bundles_post_ra>
// kernel: fused_forward.1
= control target key start
LH: loop header
LB: loop body
LE: loop exit
PB: predicated region body
PF: predicated region fallthrough
CT: control target
= control target key end

     0   :  { %v3051_v3 = vmov 0.0   ;;  %vm68_vm0 = vcmask 261120   ;;  %s3052_s23 = smov 64   ;;  %vm328_vm1 = vcmask 523264   ;;  %vm3054_vm2 = vmmov 0   ;;  %s3707_s1 = inlined_call_operand.vmem [shape: f32[32,256], index: 1, kind: input, shape index: {}]   ;;  %s3708_s2 = inlined_call_operand.vmem [shape: f32[64,256], index: 2, kind: input, shape index: {}]   ;;  %s3709_s0 = inlined_call_operand.vmem [shape: f32[128,32], index: 0, kind: input, shape index: {}]   ;;  %s3710_s3 = inlined_call_operand.vmem [shape: f32[1,256], index: 3, kind: input, shape index: {}]   ;;  %s3711_s4 = inlined_call_operand.vmem [shape: f32[32,256], index: 4, kind: input, shape index: {}]   ;;  %s3712_s5 = inlined_call_operand.vmem [shape: f32[1,256], index: 5, kind: input, shape index: {}]   ;;  %s3713_s7 = inlined_call_operand.vmem [shape: f32[64,128], index: 7, kind: input, shape index: {}]   ;;  %s3714_s6 = inlined_call_operand.vmem [shape: f32[64,128], index: 6, kind: input, shape index: {}]   ;;  %s3715_s8 = inlined_call_operand.vmem [shape: f32[1,128], index: 8, kind: input, shape index: {}]   ;;  %s3716_s9 = inlined_call_operand.vmem [shape: f32[8,128], index: 9, kind: output, shape index: {}]  }
   0x1   :  { %v49_v0 = vld [vmem:[%s3707_s1 + $0x8] sm:$0xff]  ;;  %v51_v1 = vld [vmem:[%s3707_s1 + $0x18] sm:$0xff]  ;;  %v48_v2 = vld [vmem:[%s3707_s1] sm:$0xff]  ;;  %181 = vmatprep.mubr.f32.mxu1 %v3051_v3  ;;  %936 = vmatprep.mubr.f32.mxu0 %v3051_v3 }
   0x2   :  { %v2479_v4 = vpack.c.bf16 %v51_v1, %v49_v0  ;;  %v50_v5 = vld [vmem:[%s3707_s1 + $0x10] sm:$0xff]  ;;  %v53_v6 = vld [vmem:[%s3707_s1 + $0x28] sm:$0xff]  ;;  %v55_v7 = vld [vmem:[%s3707_s1 + $0x38] sm:$0xff] }
   0x3   :  { %v2481_v8 = vpack.c.bf16 %v50_v5, %v48_v2  ;;  %v2483_v9 = vpack.c.bf16 %v55_v7, %v53_v6  ;;  %v52_v10 = vld [vmem:[%s3707_s1 + $0x20] sm:$0xff]  ;;  %v54_v11 = vld [vmem:[%s3707_s1 + $0x30] sm:$0xff]  ;;  %v311_v12 = vld [vmem:[%s3708_s2 + $0x8] sm:$0xff]  ;;  %v58_v6 = vlaneseq }
   0x4   :  { %2480 = vmatprep.subr.bf16.mxu1 %v2479_v4  ;;  %v313_v13 = vld [vmem:[%s3708_s2 + $0x18] sm:$0xff]  ;;  %v310_v14 = vld [vmem:[%s3708_s2] sm:$0xff]  ;;  %v2485_v15 = vpack.c.bf16 %v54_v11, %v52_v10  ;;  %v312_v17 = vld [vmem:[%s3708_s2 + $0x10] sm:$0xff] }
   0x5   :  { %2482 = vmatpush1.bf16.msra.mxu1 %v2481_v8  ;;  %v3140_v16 = vpack.c.bf16 %v313_v13, %v311_v12  ;;  %v3145_v18 = vpack.c.bf16 %v312_v17, %v310_v14  ;;  %v315_v19 = vld [vmem:[%s3708_s2 + $0x28] sm:$0xff]  ;;  %v317_v20 = vld [vmem:[%s3708_s2 + $0x38] sm:$0xff]  ;;  %v314_v21 = vld [vmem:[%s3708_s2 + $0x20] sm:$0xff] }
   0x6   :  { %2484 = vmatprep.subr.bf16.mxu1 %v2483_v9  ;;  %v316_v22 = vld [vmem:[%s3708_s2 + $0x30] sm:$0xff]  ;;  %v3160_v23 = vpack.c.bf16 %v317_v20, %v315_v19  ;;  %v32_v24 = vld [vmem:[%s3709_s0] sm:$0xff]  ;;  %v319_v25 = vld [vmem:[%s3708_s2 + $0x48] sm:$0xff]  ;;  %v3339_v9 = vshrl.u32 %v58_v6, 7 }
   0x7   :  { %2568 = vmatprep.subr.bf16.mxu0 %v3140_v16  ;;  %v321_v26 = vld [vmem:[%s3708_s2 + $0x58] sm:$0xff]  ;;  %v3173_v27 = vpack.c.bf16 %v316_v22, %v314_v21  ;;  %v318_v28 = vld [vmem:[%s3708_s2 + $0x40] sm:$0xff]  ;;  %v320_v29 = vld [vmem:[%s3708_s2 + $0x50] sm:$0xff] }
   0x8   :  { %2570 = vmatpush1.bf16.msra.mxu0 %v3145_v18  ;;  %v3183_v30 = vpack.c.bf16 %v321_v26, %v319_v25  ;;  %v33_v31 = vld [vmem:[%s3709_s0 + $0x8] sm:$0xff]  ;;  %v325_v33 = vld [vmem:[%s3708_s2 + $0x78] sm:$0xff]  ;;  %v3198_v34 = vpack.c.bf16 %v320_v29, %v318_v28  ;;  %v322_v35 = vld [vmem:[%s3708_s2 + $0x60] sm:$0xff]  ;;  %v64_v12 = vsub.s32 1, %v3339_v9 }
   0x9   :  { %2486 = vmatpush1.bf16.msra.mxu1 %v2485_v15  ;;  %2572 = vmatprep.subr.bf16.mxu0 %v3160_v23  ;;  %v323_v32 = vld [vmem:[%s3708_s2 + $0x68] sm:$0xff]  ;;  %v324_v36 = vld [vmem:[%s3708_s2 + $0x70] sm:$0xff]  ;;  %v35_v40 = vld [vmem:[%s3709_s0 + $0x18] sm:$0xff] }
   0xa   :  { %2488 = vmatprep.subr.bf16.mxu1 %v3140_v16  ;;  %v3208_v37 = vpack.c.bf16 %v325_v33, %v323_v32  ;;  %v34_v38 = vld [vmem:[%s3709_s0 + $0x10] sm:$0xff]  ;;  %v3217_v39 = vpack.c.bf16 %v324_v36, %v322_v35  ;;  %v36_v41 = vld [vmem:[%s3709_s0 + $0x20] sm:$0xff]  ;;  %v37_v42 = vld [vmem:[%s3709_s0 + $0x28] sm:$0xff] }
   0xb   :  { %v38_v43 = vld [vmem:[%s3709_s0 + $0x30] sm:$0xff]  ;;  %v39_v44 = vld [vmem:[%s3709_s0 + $0x38] sm:$0xff]  ;;  %v40_v45 = vld [vmem:[%s3709_s0 + $0x40] sm:$0xff] }
   0xc   :  { %2354 = vmatmul.mubr.msk.f32.vlgmr.msra.gmra.mrb[0].mxu1 %vm68_vm0, %v32_v24  ;;  %2574 = vmatpush1.bf16.msra.mxu0 %v3173_v27  ;;  %v41_v46 = vld [vmem:[%s3709_s0 + $0x48] sm:$0xff]  ;;  %v42_v47 = vld [vmem:[%s3709_s0 + $0x50] sm:$0xff]  ;;  %v43_v48 = vld [vmem:[%s3709_s0 + $0x58] sm:$0xff]  ;;  %v60_v24 = vsub.s32 0, %v3339_v9 }
   0xd   :  { %2490 = vmatpush1.bf16.msra.mxu1 %v3145_v18  ;;  %187 = vmatprep.mubr.f32.mxu1 %v3051_v3  ;;  %v44_v49 = vld [vmem:[%s3709_s0 + $0x60] sm:$0xff]  ;;  %v45_v50 = vld [vmem:[%s3709_s0 + $0x68] sm:$0xff]  ;;  %v46_v51 = vld [vmem:[%s3709_s0 + $0x70] sm:$0xff] }
   0xe   :  { %2492 = vmatprep.subr.bf16.mxu1 %v3160_v23  ;;  %2576 = vmatprep.subr.bf16.mxu0 %v3183_v30  ;;  %v47_v52 = vld [vmem:[%s3709_s0 + $0x78] sm:$0xff]  ;;  %v56_v14 = vld [vmem:[%s3710_s3] sm:$0x3] }
   0xf   :  { %v3355_v17 = vrot.slane %v56_v14, %v64_v12  ;;  %v3362_v25 = vrot.slane %v56_v14, %v60_v24  ;;  %v2178_v9 = vld [vmem:[%s3713_s7] sm:$0xff] }
  0x10   :  { %2355 = vmatmul.mubr.msk.f32.gmra.mrb[2].mxu1 %vm68_vm0, %v33_v31  ;;  %2578 = vmatpush1.bf16.msra.mxu0 %v3198_v34 }
  0x11   :  { %193 = vmatprep.mubr.f32.mxu1 %v3051_v3  ;;  %2494 = vmatpush1.bf16.msra.mxu1 %v3173_v27 }
  0x12   :  { %2496 = vmatprep.subr.bf16.mxu1 %v3183_v30  ;;  %2580 = vmatprep.subr.bf16.mxu0 %v3208_v37 }
  0x14   :  { %2356 = vmatmul.mubr.msk.f32.gmra.mrb[4].mxu1 %vm68_vm0, %v34_v38  ;;  %2582 = vmatpush1.bf16.msra.mxu0 %v3217_v39 }
  0x15   :  { %199 = vmatprep.mubr.f32.mxu1 %v3051_v3  ;;  %2498 = vmatpush1.bf16.msra.mxu1 %v3198_v34 }
  0x16   :  { %2500 = vmatprep.subr.bf16.mxu1 %v3208_v37  ;;  %2584 = vmatprep.subr.bf16.mxu0 %v3140_v16 }
  0x18   :  { %2357 = vmatmul.mubr.msk.f32.gmra.mrb[6].mxu1 %vm68_vm0, %v35_v40 }
  0x19   :  { %205 = vmatprep.mubr.f32.mxu1 %v3051_v3  ;;  %2502 = vmatpush1.bf16.msra.mxu1 %v3217_v39 }
  0x1a   :  { %2504 = vmatprep.subr.bf16.mxu1 %v3140_v16 }
  0x1c   :  { %2358 = vmatmul.mubr.msk.f32.gmra.mrb[8].mxu1 %vm68_vm0, %v36_v41 }
  0x1d   :  { %211 = vmatprep.mubr.f32.mxu1 %v3051_v3 }
  0x20   :  { %2359 = vmatmul.mubr.msk.f32.gmra.mrb[10].mxu1 %vm68_vm0, %v37_v42 }
  0x21   :  { %217 = vmatprep.mubr.f32.mxu1 %v3051_v3 }
  0x24   :  { %2360 = vmatmul.mubr.msk.f32.gmra.mrb[12].mxu1 %vm68_vm0, %v38_v43 }
  0x25   :  { %223 = vmatprep.mubr.f32.mxu1 %v3051_v3 }
  0x28   :  { %2361 = vmatmul.mubr.msk.f32.gmra.mrb[14].mxu1 %vm68_vm0, %v39_v44 }
  0x29   :  { %229 = vmatprep.mubr.f32.mxu1 %v3051_v3 }
  0x2c   :  { %2362 = vmatmul.mubr.msk.f32.gmra.mrb[16].mxu1 %vm68_vm0, %v40_v45 }
  0x2d   :  { %235 = vmatprep.mubr.f32.mxu1 %v3051_v3 }
  0x30   :  { %2363 = vmatmul.mubr.msk.f32.gmra.mrb[18].mxu1 %vm68_vm0, %v41_v46 }
  0x31   :  { %241 = vmatprep.mubr.f32.mxu1 %v3051_v3 }
  0x34   :  { %2364 = vmatmul.mubr.msk.f32.gmra.mrb[20].mxu1 %vm68_vm0, %v42_v47 }
  0x35   :  { %247 = vmatprep.mubr.f32.mxu1 %v3051_v3 }
  0x38   :  { %2365 = vmatmul.mubr.msk.f32.gmra.mrb[22].mxu1 %vm68_vm0, %v43_v48 }
  0x39   :  { %253 = vmatprep.mubr.f32.mxu1 %v3051_v3 }
  0x3c   :  { %2366 = vmatmul.mubr.msk.f32.gmra.mrb[24].mxu1 %vm68_vm0, %v44_v49 }
  0x3d   :  { %259 = vmatprep.mubr.f32.mxu1 %v3051_v3 }
  0x40   :  { %2367 = vmatmul.mubr.msk.f32.gmra.mrb[26].mxu1 %vm68_vm0, %v45_v50 }
  0x41   :  { %265 = vmatprep.mubr.f32.mxu1 %v3051_v3 }
  0x44   :  { %2368 = vmatmul.mubr.msk.f32.gmra.mrb[28].mxu1 %vm68_vm0, %v46_v51 }
  0x45   :  { %271 = vmatprep.mubr.f32.mxu1 %v3051_v3 }
  0x48   :  { %2369 = vmatmul.mubr.msk.f32.gmra.mrb[30].mxu1 %vm68_vm0, %v47_v52 }
  0x49   :  { %396 = vmatprep.mubr.f32.mxu1 %v3051_v3 }
  0x4c   :  { %397 = vmatmul.mubr.f32.vlgmr.msra.gmra.mrb[0].mxu1 %v3051_v3 }
  0x4d   :  { %2506 = vmatpush1.bf16.msra.mxu1 %v3145_v18  ;;  %504 = vmatprep.mubr.f32.mxu1 %v3051_v3 }
  0x4e   :  { %2508 = vmatprep.subr.bf16.mxu1 %v3160_v23 }
  0x51   :  { %2510 = vmatpush1.bf16.msra.mxu1 %v3173_v27 }
  0x52   :  { %2512 = vmatprep.subr.bf16.mxu1 %v3183_v30 }
  0x55   :  { %2514 = vmatpush1.bf16.msra.mxu1 %v3198_v34 }
  0x56   :  { %2516 = vmatprep.subr.bf16.mxu1 %v3208_v37 }
  0x59   :  { %2518 = vmatpush1.bf16.msra.mxu1 %v3217_v39 }
  0x5a   :  { %2520 = vmatprep.subr.bf16.mxu1 %v3140_v16 }
  0xf3   :  { %v3303_v53 = vpop.f32.mrb[10].mxu1 }
  0xf4   :  { %v3305_v54 = vpop.f32.mrb[11].mxu1 }
  0xf7   :  { %v3307_v55 = vpop.f32.mrb[12].mxu1 }
  0xf8   :  { %v3309_v56 = vpop.f32.mrb[13].mxu1 }
  0xfb   :  { %v3311_v57 = vpop.f32.mrb[14].mxu1 }
  0xfc   :  { %v3313_v58 = vpop.f32.mrb[15].mxu1 }
  0xff   :  { %v3315_v59 = vpop.f32.mrb[16].mxu1 }
 0x100   :  { %v3317_v60 = vpop.f32.mrb[17].mxu1 }
 0x103   :  { %v3319_v61 = vpop.f32.mrb[18].mxu1 }
 0x104   :  { %v3321_v62 = vpop.f32.mrb[19].mxu1 }
 0x107   :  { %v3323_v63 = vpop.f32.mrb[20].mxu1 }
 0x108   :  { %v3325_v0 = vpop.f32.mrb[21].mxu1 }
 0x10b   :  { %v3327_v1 = vpop.f32.mrb[22].mxu1 }
 0x10c   :  { %v3329_v2 = vpop.f32.mrb[23].mxu1 }
 0x10f   :  { %v3331_v4 = vpop.f32.mrb[24].mxu1 }
 0x110   :  { %v3333_v5 = vpop.f32.mrb[25].mxu1 }
 0x113   :  { %v3335_v7 = vpop.f32.mrb[26].mxu1 }
 0x114   :  { %v3337_v8 = vpop.f32.mrb[27].mxu1 }
 0x117   :  { %v3341_v10 = vpop.f32.mrb[28].mxu1 }
 0x118   :  { %v3343_v11 = vpop.f32.mrb[29].mxu1 }
 0x11b   :  { %v3346_v13 = vpop.f32.mrb[30].mxu1 }
 0x11c   :  { %v3351_v15 = vpop.f32.mrb[31].mxu1 }
 0x11f   :  { %v398_v19 = vpop.f32.mrb[0].mxu1 }
 0x120   :  { %v400_v20 = vpop.f32.mrb[1].mxu1  ;;  %v2775_v26 = vadd.f32 %v398_v19, %v3362_v25 }
 0x121   :  { %v2776_v21 = vadd.f32 %v400_v20, %v3355_v17 }
 0x122   :  { %v2370_v28 = vmul.f32 -1.442695, %v2775_v26 }
 0x123   :  { %2843 = vtanh.f32 %v2776_v21  ;;  %v2371_v42 = vmul.f32 -1.442695, %v2776_v21 }
 0x124   :  { %2845 = vpow2.f32 %v2370_v28 }
 0x12d   :  { %v2844_v22 = vpop.eup %2843 }
 0x12e   :  { %420 = vrot.lane.b32.xlu0 %v2844_v22, %s3052_s23  ;;  %v2846_v29 = vpop.eup %2845 }
 0x12f   :  { %v411_v31 = vadd.f32 1.0, %v2846_v29 }
 0x131   :  { %2847 = vrcp.f32 %v411_v31 }
 0x13b   :  { %v2848_v32 = vpop.eup %2847 }
 0x13c   :  { %v418_v36 = vmul.f32 0.0, %v2848_v32 }
 0x1a0   :  { %v421_v33 = vpop.permute.xlu0 %420 }
 0x1a1   :  { %v423_v35 = vmul.f32 %v2848_v32, %v421_v33 }
 0x1a3   :  { %425 = vrot.lane.b32.xlu0 %v423_v35, %s3052_s23 }
 0x215   :  { %v426_v38 = vpop.permute.xlu0 %425 }
 0x216   :  { %v428_v40 = vadd.f32 %v426_v38, %v418_v36 }
 0x218   :  { %2849 = vtanh.f32 %v428_v40 }
 0x219   :  { %2851 = vpow2.f32 %v2371_v42 }
 0x222   :  { %v2850_v41 = vpop.eup %2849 }
 0x223   :  { %431 = vrot.lane.b32.xlu1 %v2850_v41, %s3052_s23  ;;  %v2852_v43 = vpop.eup %2851 }
 0x224   :  { %v412_v44 = vadd.f32 1.0, %v2852_v43 }
 0x226   :  { %2853 = vrcp.f32 %v412_v44 }
 0x230   :  { %v2854_v45 = vpop.eup %2853 }
 0x295   :  { %v432_v46 = vpop.permute.xlu1 %431 }
 0x296   :  { %v434_v47 = vmul.f32 %v2854_v45, %v432_v46 }
 0x298   :  { %2372 = vmatmul.mubr.msk.f32.vlgmr.msra.gmra.mrb[2].mxu1 %vm328_vm1, %v434_v47 }
 0x299   :  { %2522 = vmatpush1.bf16.msra.mxu1 %v3145_v18  ;;  %612 = vmatprep.mubr.f32.mxu1 %v3051_v3 }
 0x29a   :  { %2524 = vmatprep.subr.bf16.mxu1 %v3160_v23 }
 0x29d   :  { %2526 = vmatpush1.bf16.msra.mxu1 %v3173_v27 }
 0x29e   :  { %2528 = vmatprep.subr.bf16.mxu1 %v3183_v30 }
 0x2a1   :  { %2530 = vmatpush1.bf16.msra.mxu1 %v3198_v34 }
 0x2a2   :  { %2532 = vmatprep.subr.bf16.mxu1 %v3208_v37 }
 0x2a5   :  { %2534 = vmatpush1.bf16.msra.mxu1 %v3217_v39 }
 0x2a6   :  { %2536 = vmatprep.subr.bf16.mxu1 %v3140_v16 }
 0x36b   :  { %v506_v48 = vpop.f32.mrb[2].mxu1 }
 0x36c   :  { %v508_v49 = vpop.f32.mrb[3].mxu1  ;;  %v2777_v52 = vadd.f32 %v506_v48, %v3362_v25 }
 0x36d   :  { %v2778_v50 = vadd.f32 %v508_v49, %v3355_v17 }
 0x36e   :  { %v2373_v6 = vmul.f32 -1.442695, %v2777_v52 }
 0x36f   :  { %2855 = vtanh.f32 %v2778_v50  ;;  %v2374_v32 = vmul.f32 -1.442695, %v2778_v50 }
 0x370   :  { %2857 = vpow2.f32 %v2373_v6 }
 0x379   :  { %v2856_v51 = vpop.eup %2855 }
 0x37a   :  { %528 = vrot.lane.b32.xlu1 %v2856_v51, %s3052_s23  ;;  %v2858_v14 = vpop.eup %2857 }
 0x37b   :  { %v519_v19 = vadd.f32 1.0, %v2858_v14 }
 0x37d   :  { %2859 = vrcp.f32 %v519_v19 }
 0x387   :  { %v2860_v20 = vpop.eup %2859 }
 0x388   :  { %v526_v26 = vmul.f32 %v2860_v20, %v428_v40 }
 0x3ec   :  { %v529_v21 = vpop.permute.xlu1 %528 }
 0x3ed   :  { %v531_v22 = vmul.f32 %v2860_v20, %v529_v21 }
 0x3ef   :  { %533 = vrot.lane.b32.xlu0 %v531_v22, %s3052_s23 }
 0x461   :  { %v534_v28 = vpop.permute.xlu0 %533 }
 0x462   :  { %v536_v29 = vadd.f32 %v534_v28, %v526_v26 }
 0x464   :  { %2861 = vtanh.f32 %v536_v29 }
 0x465   :  { %2863 = vpow2.f32 %v2374_v32 }
 0x46e   :  { %v2862_v31 = vpop.eup %2861 }
 0x46f   :  { %539 = vrot.lane.b32.xlu1 %v2862_v31, %s3052_s23  ;;  %v2864_v33 = vpop.eup %2863 }
 0x470   :  { %v520_v35 = vadd.f32 1.0, %v2864_v33 }
 0x472   :  { %2865 = vrcp.f32 %v520_v35 }
 0x47c   :  { %v2866_v36 = vpop.eup %2865 }
 0x4e1   :  { %v540_v38 = vpop.permute.xlu1 %539 }
 0x4e2   :  { %v542_v41 = vmul.f32 %v2866_v36, %v540_v38 }
 0x4e4   :  { %2375 = vmatmul.mubr.msk.f32.vlgmr.msra.gmra.mrb[4].mxu1 %vm328_vm1, %v542_v41 }
 0x4e5   :  { %2538 = vmatpush1.bf16.msra.mxu1 %v3145_v18  ;;  %720 = vmatprep.mubr.f32.mxu1 %v3051_v3 }
 0x4e6   :  { %2540 = vmatprep.subr.bf16.mxu1 %v3160_v23 }
 0x4e9   :  { %2542 = vmatpush1.bf16.msra.mxu1 %v3173_v27 }
 0x4ea   :  { %2544 = vmatprep.subr.bf16.mxu1 %v3183_v30 }
 0x4ed   :  { %2546 = vmatpush1.bf16.msra.mxu1 %v3198_v34 }
 0x4ee   :  { %2548 = vmatprep.subr.bf16.mxu1 %v3208_v37 }
 0x4f1   :  { %2550 = vmatpush1.bf16.msra.mxu1 %v3217_v39 }
 0x4f2   :  { %2552 = vmatprep.subr.bf16.mxu1 %v3140_v16 }
 0x5b7   :  { %v614_v40 = vpop.f32.mrb[4].mxu1 }
 0x5b8   :  { %v616_v42 = vpop.f32.mrb[5].mxu1  ;;  %v2779_v45 = vadd.f32 %v614_v40, %v3362_v25 }
 0x5b9   :  { %v2780_v43 = vadd.f32 %v616_v42, %v3355_v17 }
 0x5ba   :  { %v2376_v46 = vmul.f32 -1.442695, %v2779_v45 }
 0x5bb   :  { %2867 = vtanh.f32 %v2780_v43  ;;  %v2377_v20 = vmul.f32 -1.442695, %v2780_v43 }
 0x5bc   :  { %2869 = vpow2.f32 %v2376_v46 }
 0x5c5   :  { %v2868_v44 = vpop.eup %2867 }
 0x5c6   :  { %636 = vrot.lane.b32.xlu0 %v2868_v44, %s3052_s23  ;;  %v2870_v47 = vpop.eup %2869 }
 0x5c7   :  { %v627_v48 = vadd.f32 1.0, %v2870_v47 }
 0x5c9   :  { %2871 = vrcp.f32 %v627_v48 }
 0x5d3   :  { %v2872_v49 = vpop.eup %2871 }
 0x5d4   :  { %v634_v52 = vmul.f32 %v2872_v49, %v536_v29 }
 0x638   :  { %v637_v50 = vpop.permute.xlu0 %636 }
 0x639   :  { %v639_v51 = vmul.f32 %v2872_v49, %v637_v50 }
 0x63b   :  { %641 = vrot.lane.b32.xlu1 %v639_v51, %s3052_s23 }
 0x6ad   :  { %v642_v6 = vpop.permute.xlu1 %641 }
 0x6ae   :  { %v644_v14 = vadd.f32 %v642_v6, %v634_v52 }
 0x6b0   :  { %2873 = vtanh.f32 %v644_v14 }
 0x6b1   :  { %2875 = vpow2.f32 %v2377_v20 }
 0x6ba   :  { %v2874_v19 = vpop.eup %2873 }
 0x6bb   :  { %647 = vrot.lane.b32.xlu0 %v2874_v19, %s3052_s23  ;;  %v2876_v21 = vpop.eup %2875 }
 0x6bc   :  { %v628_v22 = vadd.f32 1.0, %v2876_v21 }
 0x6be   :  { %2877 = vrcp.f32 %v628_v22 }
 0x6c8   :  { %v2878_v26 = vpop.eup %2877 }
 0x72d   :  { %v648_v28 = vpop.permute.xlu0 %647 }
 0x72e   :  { %v650_v31 = vmul.f32 %v2878_v26, %v648_v28 }
 0x730   :  { %2378 = vmatmul.mubr.msk.f32.vlgmr.msra.gmra.mrb[6].mxu1 %vm328_vm1, %v650_v31 }
 0x731   :  { %2554 = vmatpush1.bf16.msra.mxu1 %v3145_v18  ;;  %828 = vmatprep.mubr.f32.mxu1 %v3051_v3 }
 0x732   :  { %2556 = vmatprep.subr.bf16.mxu1 %v3160_v23 }
 0x735   :  { %2558 = vmatpush1.bf16.msra.mxu1 %v3173_v27 }
 0x736   :  { %2560 = vmatprep.subr.bf16.mxu1 %v3183_v30 }
 0x739   :  { %2562 = vmatpush1.bf16.msra.mxu1 %v3198_v34 }
 0x73a   :  { %2564 = vmatprep.subr.bf16.mxu1 %v3208_v37 }
 0x73d   :  { %2566 = vmatpush1.bf16.msra.mxu1 %v3217_v39 }
 0x803   :  { %v722_v29 = vpop.f32.mrb[6].mxu1 }
 0x804   :  { %v724_v32 = vpop.f32.mrb[7].mxu1  ;;  %v2781_v36 = vadd.f32 %v722_v29, %v3362_v25 }
 0x805   :  { %v2782_v33 = vadd.f32 %v724_v32, %v3355_v17 }
 0x806   :  { %v2379_v38 = vmul.f32 -1.442695, %v2781_v36 }
 0x807   :  { %2879 = vtanh.f32 %v2782_v33  ;;  %v2380_v49 = vmul.f32 -1.442695, %v2782_v33 }
 0x808   :  { %2881 = vpow2.f32 %v2379_v38 }
 0x811   :  { %v2880_v35 = vpop.eup %2879 }
 0x812   :  { %744 = vrot.lane.b32.xlu1 %v2880_v35, %s3052_s23  ;;  %v2882_v41 = vpop.eup %2881 }
 0x813   :  { %v735_v40 = vadd.f32 1.0, %v2882_v41 }
 0x815   :  { %2883 = vrcp.f32 %v735_v40 }
 0x81f   :  { %v2884_v42 = vpop.eup %2883 }
 0x820   :  { %v742_v45 = vmul.f32 %v2884_v42, %v644_v14 }
 0x884   :  { %v745_v43 = vpop.permute.xlu1 %744 }
 0x885   :  { %v747_v44 = vmul.f32 %v2884_v42, %v745_v43 }
 0x887   :  { %749 = vrot.lane.b32.xlu0 %v747_v44, %s3052_s23 }
 0x8f9   :  { %v750_v46 = vpop.permute.xlu0 %749 }
 0x8fa   :  { %v752_v47 = vadd.f32 %v750_v46, %v742_v45 }
 0x8fc   :  { %2885 = vtanh.f32 %v752_v47 }
 0x8fd   :  { %2887 = vpow2.f32 %v2380_v49  ;;  %v216_v49 = vadd.f32 %v3305_v54, %v3355_v17 }
 0x906   :  { %v2886_v48 = vpop.eup %2885 }
 0x907   :  { %755 = vrot.lane.b32.xlu1 %v2886_v48, %s3052_s23  ;;  %v2888_v50 = vpop.eup %2887 }
 0x908   :  { %v736_v51 = vadd.f32 1.0, %v2888_v50 }
 0x90a   :  { %2889 = vrcp.f32 %v736_v51 }
 0x914   :  { %v2890_v52 = vpop.eup %2889 }
 0x979   :  { %v756_v6 = vpop.permute.xlu1 %755 }
 0x97a   :  { %v758_v19 = vmul.f32 %v2890_v52, %v756_v6 }
 0x97c   :  { %2381 = vmatmul.mubr.msk.f32.vlgmr.msra.gmra.mrb[8].mxu1 %vm328_vm1, %v758_v19 }
 0x97d   :  { %2143 = vmatprep.mubr.f32.mxu1 %v3051_v3 }
 0xa4f   :  { %v830_v20 = vpop.f32.mrb[8].mxu1 }
 0xa50   :  { %v832_v14 = vpop.f32.mrb[9].mxu1  ;;  %v2783_v26 = vadd.f32 %v830_v20, %v3362_v25 }
 0xa51   :  { %v2784_v21 = vadd.f32 %v832_v14, %v3355_v17 }
 0xa52   :  { %v2382_v28 = vmul.f32 -1.442695, %v2783_v26 }
 0xa53   :  { %2891 = vtanh.f32 %v2784_v21  ;;  %v2383_v42 = vmul.f32 -1.442695, %v2784_v21 }
 0xa54   :  { %2893 = vpow2.f32 %v2382_v28 }
 0xa5d   :  { %v2892_v22 = vpop.eup %2891 }
 0xa5e   :  { %852 = vrot.lane.b32.xlu0 %v2892_v22, %s3052_s23  ;;  %v2894_v31 = vpop.eup %2893 }
 0xa5f   :  { %v843_v29 = vadd.f32 1.0, %v2894_v31 }
 0xa61   :  { %2895 = vrcp.f32 %v843_v29 }
 0xa6b   :  { %v2896_v32 = vpop.eup %2895 }
 0xa6c   :  { %v850_v36 = vmul.f32 %v2896_v32, %v752_v47  ;;  %v214_v47 = vadd.f32 %v3303_v53, %v3362_v25 }
 0xad0   :  { %v853_v33 = vpop.permute.xlu0 %852 }
 0xad1   :  { %v855_v35 = vmul.f32 %v2896_v32, %v853_v33 }
 0xad3   :  { %857 = vrot.lane.b32.xlu1 %v855_v35, %s3052_s23 }
 0xb45   :  { %v858_v38 = vpop.permute.xlu1 %857 }
 0xb46   :  { %v860_v41 = vadd.f32 %v858_v38, %v850_v36 }
 0xb48   :  { %2897 = vtanh.f32 %v860_v41 }
 0xb49   :  { %2899 = vpow2.f32 %v2383_v42  ;;  %v222_v42 = vadd.f32 %v3309_v56, %v3355_v17 }
 0xb52   :  { %v2898_v40 = vpop.eup %2897 }
 0xb53   :  { %863 = vrot.lane.b32.xlu0 %v2898_v40, %s3052_s23  ;;  %v2900_v43 = vpop.eup %2899 }
 0xb54   :  { %v844_v44 = vadd.f32 1.0, %v2900_v43 }
 0xb56   :  { %2901 = vrcp.f32 %v844_v44 }
 0xb60   :  { %v2902_v45 = vpop.eup %2901 }
 0xbc5   :  { %v864_v46 = vpop.permute.xlu0 %863 }
 0xbc6   :  { %v866_v48 = vmul.f32 %v2902_v45, %v864_v46 }
 0xbc8   :  { %2384 = vmatmul.mubr.msk.f32.vlgmr.msra.gmra.mrb[0].mxu0 %vm328_vm1, %v866_v48 }
 0xbc9   :  { %2586 = vmatpush1.bf16.msra.mxu0 %v3145_v18  ;;  %1044 = vmatprep.mubr.f32.mxu0 %v3051_v3 }
 0xbca   :  { %2588 = vmatprep.subr.bf16.mxu0 %v3160_v23 }
 0xbcd   :  { %2590 = vmatpush1.bf16.msra.mxu0 %v3173_v27 }
 0xbce   :  { %2592 = vmatprep.subr.bf16.mxu0 %v3183_v30 }
 0xbd1   :  { %2594 = vmatpush1.bf16.msra.mxu0 %v3198_v34 }
 0xbd2   :  { %2596 = vmatprep.subr.bf16.mxu0 %v3208_v37 }
 0xbd5   :  { %2598 = vmatpush1.bf16.msra.mxu0 %v3217_v39 }
 0xbd6   :  { %2600 = vmatprep.subr.bf16.mxu0 %v3140_v16 }
 0xc9b   :  { %v938_v50 = vpop.f32.mrb[0].mxu0 }
 0xc9c   :  { %v943_v51 = vadd.f32 %v938_v50, %v214_v47  ;;  %v940_v52 = vpop.f32.mrb[1].mxu0 }
 0xc9d   :  { %v944_v6 = vadd.f32 %v940_v52, %v216_v49 }
 0xc9e   :  { %v2385_v20 = vmul.f32 -1.442695, %v943_v51 }
 0xc9f   :  { %2903 = vtanh.f32 %v944_v6  ;;  %v2386_v32 = vmul.f32 -1.442695, %v944_v6 }
 0xca0   :  { %2905 = vpow2.f32 %v2385_v20 }
 0xca9   :  { %v2904_v19 = vpop.eup %2903 }
 0xcaa   :  { %960 = vrot.lane.b32.xlu1 %v2904_v19, %s3052_s23  ;;  %v2906_v14 = vpop.eup %2905 }
 0xcab   :  { %v951_v21 = vadd.f32 1.0, %v2906_v14 }
 0xcad   :  { %2907 = vrcp.f32 %v951_v21 }
 0xcb7   :  { %v2908_v22 = vpop.eup %2907 }
 0xcb8   :  { %v958_v53 = vmul.f32 %v2908_v22, %v860_v41  ;;  %v220_v41 = vadd.f32 %v3307_v55, %v3362_v25 }
 0xd1c   :  { %v961_v26 = vpop.permute.xlu1 %960 }
 0xd1d   :  { %v963_v28 = vmul.f32 %v2908_v22, %v961_v26 }
 0xd1f   :  { %965 = vrot.lane.b32.xlu0 %v963_v28, %s3052_s23 }
 0xd91   :  { %v966_v54 = vpop.permute.xlu0 %965 }
 0xd92   :  { %v968_v31 = vadd.f32 %v966_v54, %v958_v53  ;;  %v226_v54 = vadd.f32 %v3311_v57, %v3362_v25 }
 0xd94   :  { %2909 = vtanh.f32 %v968_v31 }
 0xd95   :  { %2911 = vpow2.f32 %v2386_v32 }
 0xd9e   :  { %v2910_v29 = vpop.eup %2909 }
 0xd9f   :  { %971 = vrot.lane.b32.xlu1 %v2910_v29, %s3052_s23  ;;  %v2912_v33 = vpop.eup %2911 }
 0xda0   :  { %v952_v35 = vadd.f32 1.0, %v2912_v33 }
 0xda2   :  { %2913 = vrcp.f32 %v952_v35 }
 0xdac   :  { %v2914_v36 = vpop.eup %2913 }
 0xe11   :  { %v972_v38 = vpop.permute.xlu1 %971 }
 0xe12   :  { %v974_v40 = vmul.f32 %v2914_v36, %v972_v38 }
 0xe14   :  { %2387 = vmatmul.mubr.msk.f32.vlgmr.msra.gmra.mrb[2].mxu0 %vm328_vm1, %v974_v40 }
 0xe15   :  { %2602 = vmatpush1.bf16.msra.mxu0 %v3145_v18  ;;  %1152 = vmatprep.mubr.f32.mxu0 %v3051_v3 }
 0xe16   :  { %2604 = vmatprep.subr.bf16.mxu0 %v3160_v23 }
 0xe19   :  { %2606 = vmatpush1.bf16.msra.mxu0 %v3173_v27 }
 0xe1a   :  { %2608 = vmatprep.subr.bf16.mxu0 %v3183_v30 }
 0xe1d   :  { %2610 = vmatpush1.bf16.msra.mxu0 %v3198_v34 }
 0xe1e   :  { %2612 = vmatprep.subr.bf16.mxu0 %v3208_v37 }
 0xe21   :  { %2614 = vmatpush1.bf16.msra.mxu0 %v3217_v39 }
 0xe22   :  { %2616 = vmatprep.subr.bf16.mxu0 %v3140_v16 }
 0xee7   :  { %v1046_v43 = vpop.f32.mrb[2].mxu0 }
 0xee8   :  { %v1051_v44 = vadd.f32 %v1046_v43, %v220_v41  ;;  %v1048_v45 = vpop.f32.mrb[3].mxu0 }
 0xee9   :  { %v1052_v46 = vadd.f32 %v1048_v45, %v222_v42 }
 0xeea   :  { %v2388_v47 = vmul.f32 -1.442695, %v1051_v44 }
 0xeeb   :  { %2915 = vtanh.f32 %v1052_v46  ;;  %v2389_v14 = vmul.f32 -1.442695, %v1052_v46 }
 0xeec   :  { %2917 = vpow2.f32 %v2388_v47 }
 0xef5   :  { %v2916_v48 = vpop.eup %2915 }
 0xef6   :  { %1068 = vrot.lane.b32.xlu0 %v2916_v48, %s3052_s23  ;;  %v2918_v49 = vpop.eup %2917 }
 0xef7   :  { %v1059_v50 = vadd.f32 1.0, %v2918_v49 }
 0xef9   :  { %2919 = vrcp.f32 %v1059_v50 }
 0xf03   :  { %v2920_v51 = vpop.eup %2919 }
 0xf04   :  { %v1066_v55 = vmul.f32 %v2920_v51, %v968_v31  ;;  %v228_v31 = vadd.f32 %v3313_v58, %v3355_v17 }
 0xf68   :  { %v1069_v52 = vpop.permute.xlu0 %1068 }
 0xf69   :  { %v1071_v6 = vmul.f32 %v2920_v51, %v1069_v52 }
 0xf6b   :  { %1073 = vrot.lane.b32.xlu1 %v1071_v6, %s3052_s23  ;;  %v232_v6 = vadd.f32 %v3315_v59, %v3362_v25 }
 0xfdd   :  { %v1074_v56 = vpop.permute.xlu1 %1073 }
 0xfde   :  { %v1076_v19 = vadd.f32 %v1074_v56, %v1066_v55  ;;  %v234_v55 = vadd.f32 %v3317_v60, %v3355_v17 }
 0xfe0   :  { %2921 = vtanh.f32 %v1076_v19 }
 0xfe1   :  { %2923 = vpow2.f32 %v2389_v14 }
 0xfea   :  { %v2922_v20 = vpop.eup %2921 }
 0xfeb   :  { %1079 = vrot.lane.b32.xlu0 %v2922_v20, %s3052_s23  ;;  %v2924_v21 = vpop.eup %2923 }
 0xfec   :  { %v1060_v22 = vadd.f32 1.0, %v2924_v21 }
 0xfee   :  { %2925 = vrcp.f32 %v1060_v22 }
 0xff8   :  { %v2926_v26 = vpop.eup %2925 }
0x105d   :  { %v1080_v28 = vpop.permute.xlu0 %1079 }
0x105e   :  { %v1082_v53 = vmul.f32 %v2926_v26, %v1080_v28 }
0x1060   :  { %2390 = vmatmul.mubr.msk.f32.vlgmr.msra.gmra.mrb[4].mxu0 %vm328_vm1, %v1082_v53 }
0x1061   :  { %2618 = vmatpush1.bf16.msra.mxu0 %v3145_v18  ;;  %1260 = vmatprep.mubr.f32.mxu0 %v3051_v3 }
0x1062   :  { %2620 = vmatprep.subr.bf16.mxu0 %v3160_v23 }
0x1065   :  { %2622 = vmatpush1.bf16.msra.mxu0 %v3173_v27 }
0x1066   :  { %2624 = vmatprep.subr.bf16.mxu0 %v3183_v30 }
0x1069   :  { %2626 = vmatpush1.bf16.msra.mxu0 %v3198_v34 }
0x106a   :  { %2628 = vmatprep.subr.bf16.mxu0 %v3208_v37 }
0x106d   :  { %2630 = vmatpush1.bf16.msra.mxu0 %v3217_v39 }
0x106e   :  { %2632 = vmatprep.subr.bf16.mxu0 %v3140_v16 }
0x1133   :  { %v1154_v29 = vpop.f32.mrb[4].mxu0 }
0x1134   :  { %v1159_v32 = vadd.f32 %v1154_v29, %v226_v54  ;;  %v1156_v33 = vpop.f32.mrb[5].mxu0 }
0x1135   :  { %v1160_v35 = vadd.f32 %v1156_v33, %v228_v31 }
0x1136   :  { %v2391_v38 = vmul.f32 -1.442695, %v1159_v32 }
0x1137   :  { %2927 = vtanh.f32 %v1160_v35  ;;  %v2392_v48 = vmul.f32 -1.442695, %v1160_v35 }
0x1138   :  { %2929 = vpow2.f32 %v2391_v38 }
0x1141   :  { %v2928_v36 = vpop.eup %2927 }
0x1142   :  { %1176 = vrot.lane.b32.xlu1 %v2928_v36, %s3052_s23  ;;  %v2930_v40 = vpop.eup %2929 }
0x1143   :  { %v1167_v41 = vadd.f32 1.0, %v2930_v40 }
0x1145   :  { %2931 = vrcp.f32 %v1167_v41 }
0x114f   :  { %v2932_v42 = vpop.eup %2931 }
0x1150   :  { %v1174_v57 = vmul.f32 %v2932_v42, %v1076_v19 }
0x11b4   :  { %v1177_v43 = vpop.permute.xlu1 %1176 }
0x11b5   :  { %v1179_v44 = vmul.f32 %v2932_v42, %v1177_v43  ;;  %v238_v42 = vadd.f32 %v3319_v61, %v3362_v25  ;;  %v240_v43 = vadd.f32 %v3321_v62, %v3355_v17 }
0x11b7   :  { %1181 = vrot.lane.b32.xlu0 %v1179_v44, %s3052_s23 }
0x1229   :  { %v1182_v58 = vpop.permute.xlu0 %1181 }
0x122a   :  { %v1184_v45 = vadd.f32 %v1182_v58, %v1174_v57 }
0x122c   :  { %2933 = vtanh.f32 %v1184_v45 }
0x122d   :  { %2935 = vpow2.f32 %v2392_v48 }
0x1236   :  { %v2934_v46 = vpop.eup %2933 }
0x1237   :  { %1187 = vrot.lane.b32.xlu1 %v2934_v46, %s3052_s23  ;;  %v2936_v47 = vpop.eup %2935 }
0x1238   :  { %v1168_v49 = vadd.f32 1.0, %v2936_v47 }
0x123a   :  { %2937 = vrcp.f32 %v1168_v49 }
0x1244   :  { %v2938_v50 = vpop.eup %2937 }
0x12a9   :  { %v1188_v51 = vpop.permute.xlu1 %1187 }
0x12aa   :  { %v1190_v52 = vmul.f32 %v2938_v50, %v1188_v51 }
0x12ac   :  { %2393 = vmatmul.mubr.msk.f32.vlgmr.msra.gmra.mrb[6].mxu0 %vm328_vm1, %v1190_v52 }
0x12ad   :  { %2634 = vmatpush1.bf16.msra.mxu0 %v3145_v18  ;;  %1368 = vmatprep.mubr.f32.mxu0 %v3051_v3 }
0x12ae   :  { %2636 = vmatprep.subr.bf16.mxu0 %v3160_v23 }
0x12b1   :  { %2638 = vmatpush1.bf16.msra.mxu0 %v3173_v27 }
0x12b2   :  { %2640 = vmatprep.subr.bf16.mxu0 %v3183_v30 }
0x12b5   :  { %2642 = vmatpush1.bf16.msra.mxu0 %v3198_v34 }
0x12b6   :  { %2644 = vmatprep.subr.bf16.mxu0 %v3208_v37 }
0x12b9   :  { %2646 = vmatpush1.bf16.msra.mxu0 %v3217_v39 }
0x12ba   :  { %2648 = vmatprep.subr.bf16.mxu0 %v3140_v16 }
0x137f   :  { %v1262_v56 = vpop.f32.mrb[6].mxu0 }
0x1380   :  { %v1267_v19 = vadd.f32 %v1262_v56, %v232_v6  ;;  %v1264_v20 = vpop.f32.mrb[7].mxu0 }
0x1381   :  { %v1268_v14 = vadd.f32 %v1264_v20, %v234_v55 }
0x1382   :  { %v2394_v22 = vmul.f32 -1.442695, %v1267_v19 }
0x1383   :  { %2939 = vtanh.f32 %v1268_v14  ;;  %v2395_v33 = vmul.f32 -1.442695, %v1268_v14 }
0x1384   :  { %2941 = vpow2.f32 %v2394_v22 }
0x138d   :  { %v2940_v21 = vpop.eup %2939 }
0x138e   :  { %1284 = vrot.lane.b32.xlu0 %v2940_v21, %s3052_s23  ;;  %v2942_v26 = vpop.eup %2941 }
0x138f   :  { %v1275_v28 = vadd.f32 1.0, %v2942_v26  ;;  %v244_v26 = vadd.f32 %v3323_v63, %v3362_v25 }
0x1391   :  { %2943 = vrcp.f32 %v1275_v28  ;;  %v246_v28 = vadd.f32 %v3325_v0, %v3355_v17 }
0x139b   :  { %v2944_v53 = vpop.eup %2943 }
0x139c   :  { %v1282_v59 = vmul.f32 %v2944_v53, %v1184_v45 }
0x1400   :  { %v1285_v54 = vpop.permute.xlu0 %1284 }
0x1401   :  { %v1287_v31 = vmul.f32 %v2944_v53, %v1285_v54 }
0x1403   :  { %1289 = vrot.lane.b32.xlu1 %v1287_v31, %s3052_s23 }
0x1475   :  { %v1290_v60 = vpop.permute.xlu1 %1289 }
0x1476   :  { %v1292_v29 = vadd.f32 %v1290_v60, %v1282_v59 }
0x1478   :  { %2945 = vtanh.f32 %v1292_v29 }
0x1479   :  { %2947 = vpow2.f32 %v2395_v33 }
0x1482   :  { %v2946_v32 = vpop.eup %2945 }
0x1483   :  { %1295 = vrot.lane.b32.xlu0 %v2946_v32, %s3052_s23  ;;  %v2948_v35 = vpop.eup %2947 }
0x1484   :  { %v1276_v36 = vadd.f32 1.0, %v2948_v35 }
0x1486   :  { %2949 = vrcp.f32 %v1276_v36 }
0x1490   :  { %v2950_v38 = vpop.eup %2949 }
0x14f5   :  { %v1296_v40 = vpop.permute.xlu0 %1295 }
0x14f6   :  { %v1298_v41 = vmul.f32 %v2950_v38, %v1296_v40 }
0x14f8   :  { %2396 = vmatmul.mubr.msk.f32.vlgmr.msra.gmra.mrb[8].mxu0 %vm328_vm1, %v1298_v41 }
0x14f9   :  { %2650 = vmatpush1.bf16.msra.mxu0 %v3145_v18  ;;  %1476 = vmatprep.mubr.f32.mxu0 %v3051_v3 }
0x14fa   :  { %2652 = vmatprep.subr.bf16.mxu0 %v3160_v23 }
0x14fd   :  { %2654 = vmatpush1.bf16.msra.mxu0 %v3173_v27 }
0x14fe   :  { %2656 = vmatprep.subr.bf16.mxu0 %v3183_v30 }
0x1501   :  { %2658 = vmatpush1.bf16.msra.mxu0 %v3198_v34 }
0x1502   :  { %2660 = vmatprep.subr.bf16.mxu0 %v3208_v37 }
0x1505   :  { %2662 = vmatpush1.bf16.msra.mxu0 %v3217_v39 }
0x1506   :  { %2664 = vmatprep.subr.bf16.mxu0 %v3140_v16 }
0x15cb   :  { %v1370_v44 = vpop.f32.mrb[8].mxu0 }
0x15cc   :  { %v1375_v57 = vadd.f32 %v1370_v44, %v238_v42  ;;  %v1372_v58 = vpop.f32.mrb[9].mxu0 }
0x15cd   :  { %v1376_v45 = vadd.f32 %v1372_v58, %v240_v43 }
0x15ce   :  { %v2397_v48 = vmul.f32 -1.442695, %v1375_v57 }
0x15cf   :  { %2951 = vtanh.f32 %v1376_v45  ;;  %v2398_v56 = vmul.f32 -1.442695, %v1376_v45 }
0x15d0   :  { %2953 = vpow2.f32 %v2397_v48  ;;  %v252_v48 = vadd.f32 %v3329_v2, %v3355_v17 }
0x15d9   :  { %v2952_v46 = vpop.eup %2951 }
0x15da   :  { %1392 = vrot.lane.b32.xlu1 %v2952_v46, %s3052_s23  ;;  %v2954_v47 = vpop.eup %2953  ;;  %v250_v46 = vadd.f32 %v3327_v1, %v3362_v25 }
0x15db   :  { %v1383_v49 = vadd.f32 1.0, %v2954_v47 }
0x15dd   :  { %2955 = vrcp.f32 %v1383_v49 }
0x15e7   :  { %v2956_v50 = vpop.eup %2955 }
0x15e8   :  { %v1390_v61 = vmul.f32 %v2956_v50, %v1292_v29 }
0x164c   :  { %v1393_v51 = vpop.permute.xlu1 %1392 }
0x164d   :  { %v1395_v52 = vmul.f32 %v2956_v50, %v1393_v51 }
0x164f   :  { %1397 = vrot.lane.b32.xlu0 %v1395_v52, %s3052_s23 }
0x16c1   :  { %v1398_v62 = vpop.permute.xlu0 %1397 }
0x16c2   :  { %v1400_v6 = vadd.f32 %v1398_v62, %v1390_v61 }
0x16c4   :  { %2957 = vtanh.f32 %v1400_v6 }
0x16c5   :  { %2959 = vpow2.f32 %v2398_v56 }
0x16ce   :  { %v2958_v55 = vpop.eup %2957 }
0x16cf   :  { %1403 = vrot.lane.b32.xlu1 %v2958_v55, %s3052_s23  ;;  %v2960_v19 = vpop.eup %2959 }
0x16d0   :  { %v1384_v20 = vadd.f32 1.0, %v2960_v19 }
0x16d2   :  { %2961 = vrcp.f32 %v1384_v20 }
0x16dc   :  { %v2962_v14 = vpop.eup %2961 }
0x1741   :  { %v1404_v21 = vpop.permute.xlu1 %1403 }
0x1742   :  { %v1406_v22 = vmul.f32 %v2962_v14, %v1404_v21 }
0x1744   :  { %2399 = vmatmul.mubr.msk.f32.vlgmr.msra.gmra.mrb[10].mxu0 %vm328_vm1, %v1406_v22 }
0x1745   :  { %2666 = vmatpush1.bf16.msra.mxu0 %v3145_v18  ;;  %1584 = vmatprep.mubr.f32.mxu0 %v3051_v3 }
0x1746   :  { %2668 = vmatprep.subr.bf16.mxu0 %v3160_v23 }
0x1749   :  { %2670 = vmatpush1.bf16.msra.mxu0 %v3173_v27 }
0x174a   :  { %2672 = vmatprep.subr.bf16.mxu0 %v3183_v30 }
0x174d   :  { %2674 = vmatpush1.bf16.msra.mxu0 %v3198_v34 }
0x174e   :  { %2676 = vmatprep.subr.bf16.mxu0 %v3208_v37 }
0x1751   :  { %2678 = vmatpush1.bf16.msra.mxu0 %v3217_v39 }
0x1752   :  { %2680 = vmatprep.subr.bf16.mxu0 %v3140_v16 }
0x1817   :  { %v1478_v53 = vpop.f32.mrb[10].mxu0 }
0x1818   :  { %v1483_v54 = vadd.f32 %v1478_v53, %v244_v26  ;;  %v1480_v31 = vpop.f32.mrb[11].mxu0 }
0x1819   :  { %v1484_v59 = vadd.f32 %v1480_v31, %v246_v28  ;;  %v256_v31 = vadd.f32 %v3331_v4, %v3362_v25 }
0x181a   :  { %v2400_v29 = vmul.f32 -1.442695, %v1483_v54 }
0x181b   :  { %2963 = vtanh.f32 %v1484_v59  ;;  %v2401_v42 = vmul.f32 -1.442695, %v1484_v59  ;;  %v258_v59 = vadd.f32 %v3333_v5, %v3355_v17 }
0x181c   :  { %2965 = vpow2.f32 %v2400_v29 }
0x1825   :  { %v2964_v60 = vpop.eup %2963 }
0x1826   :  { %1500 = vrot.lane.b32.xlu0 %v2964_v60, %s3052_s23  ;;  %v2966_v32 = vpop.eup %2965 }
0x1827   :  { %v1491_v33 = vadd.f32 1.0, %v2966_v32 }
0x1829   :  { %2967 = vrcp.f32 %v1491_v33 }
0x1833   :  { %v2968_v35 = vpop.eup %2967 }
0x1834   :  { %v1498_v63 = vmul.f32 %v2968_v35, %v1400_v6 }
0x1898   :  { %v1501_v36 = vpop.permute.xlu0 %1500 }
0x1899   :  { %v1503_v38 = vmul.f32 %v2968_v35, %v1501_v36 }
0x189b   :  { %1505 = vrot.lane.b32.xlu1 %v1503_v38, %s3052_s23 }
0x190d   :  { %v1506_v0 = vpop.permute.xlu1 %1505 }
0x190e   :  { %v1508_v40 = vadd.f32 %v1506_v0, %v1498_v63 }
0x1910   :  { %2969 = vtanh.f32 %v1508_v40 }
0x1911   :  { %2971 = vpow2.f32 %v2401_v42 }
0x191a   :  { %v2970_v41 = vpop.eup %2969 }
0x191b   :  { %1511 = vrot.lane.b32.xlu0 %v2970_v41, %s3052_s23  ;;  %v2972_v43 = vpop.eup %2971 }
0x191c   :  { %v1492_v44 = vadd.f32 1.0, %v2972_v43 }
0x191e   :  { %2973 = vrcp.f32 %v1492_v44 }
0x1928   :  { %v2974_v57 = vpop.eup %2973 }
0x198d   :  { %v1512_v58 = vpop.permute.xlu0 %1511 }
0x198e   :  { %v1514_v45 = vmul.f32 %v2974_v57, %v1512_v58 }
0x1990   :  { %2402 = vmatmul.mubr.msk.f32.vlgmr.msra.gmra.mrb[12].mxu0 %vm328_vm1, %v1514_v45 }
0x1991   :  { %2682 = vmatpush1.bf16.msra.mxu0 %v3145_v18  ;;  %1692 = vmatprep.mubr.f32.mxu0 %v3051_v3 }
0x1992   :  { %2684 = vmatprep.subr.bf16.mxu0 %v3160_v23 }
0x1995   :  { %2686 = vmatpush1.bf16.msra.mxu0 %v3173_v27 }
0x1996   :  { %2688 = vmatprep.subr.bf16.mxu0 %v3183_v30 }
0x1999   :  { %2690 = vmatpush1.bf16.msra.mxu0 %v3198_v34 }
0x199a   :  { %2692 = vmatprep.subr.bf16.mxu0 %v3208_v37 }
0x199d   :  { %2694 = vmatpush1.bf16.msra.mxu0 %v3217_v39 }
0x199e   :  { %2696 = vmatprep.subr.bf16.mxu0 %v3140_v16 }
0x1a63   :  { %v1586_v47 = vpop.f32.mrb[12].mxu0 }
0x1a64   :  { %v1591_v49 = vadd.f32 %v1586_v47, %v250_v46  ;;  %v1588_v50 = vpop.f32.mrb[13].mxu0  ;;  %v262_v47 = vadd.f32 %v3335_v7, %v3362_v25 }
0x1a65   :  { %v1592_v51 = vadd.f32 %v1588_v50, %v252_v48 }
0x1a66   :  { %v2403_v61 = vmul.f32 -1.442695, %v1591_v49  ;;  %v264_v49 = vadd.f32 %v3337_v8, %v3355_v17 }
0x1a67   :  { %2975 = vtanh.f32 %v1592_v51  ;;  %v2404_v21 = vmul.f32 -1.442695, %v1592_v51 }
0x1a68   :  { %2977 = vpow2.f32 %v2403_v61 }
0x1a71   :  { %v2976_v52 = vpop.eup %2975 }
0x1a72   :  { %1608 = vrot.lane.b32.xlu1 %v2976_v52, %s3052_s23  ;;  %v2978_v62 = vpop.eup %2977 }
0x1a73   :  { %v1599_v6 = vadd.f32 1.0, %v2978_v62 }
0x1a75   :  { %2979 = vrcp.f32 %v1599_v6 }
0x1a7f   :  { %v2980_v55 = vpop.eup %2979 }
0x1a80   :  { %v1606_v1 = vmul.f32 %v2980_v55, %v1508_v40 }
0x1ae4   :  { %v1609_v56 = vpop.permute.xlu1 %1608 }
0x1ae5   :  { %v1611_v19 = vmul.f32 %v2980_v55, %v1609_v56 }
0x1ae7   :  { %1613 = vrot.lane.b32.xlu0 %v1611_v19, %s3052_s23 }
0x1b59   :  { %v1614_v2 = vpop.permute.xlu0 %1613 }
0x1b5a   :  { %v1616_v20 = vadd.f32 %v1614_v2, %v1606_v1 }
0x1b5c   :  { %2981 = vtanh.f32 %v1616_v20 }
0x1b5d   :  { %2983 = vpow2.f32 %v2404_v21 }
0x1b66   :  { %v2982_v14 = vpop.eup %2981 }
0x1b67   :  { %1619 = vrot.lane.b32.xlu1 %v2982_v14, %s3052_s23  ;;  %v2984_v22 = vpop.eup %2983 }
0x1b68   :  { %v1600_v26 = vadd.f32 1.0, %v2984_v22 }
0x1b6a   :  { %2985 = vrcp.f32 %v1600_v26 }
0x1b74   :  { %v2986_v28 = vpop.eup %2985 }
0x1bd9   :  { %v1620_v53 = vpop.permute.xlu1 %1619 }
0x1bda   :  { %v1622_v54 = vmul.f32 %v2986_v28, %v1620_v53 }
0x1bdc   :  { %2405 = vmatmul.mubr.msk.f32.vlgmr.msra.gmra.mrb[14].mxu0 %vm328_vm1, %v1622_v54  ;;  %v268_v54 = vadd.f32 %v3341_v10, %v3362_v25 }
0x1bdd   :  { %2698 = vmatpush1.bf16.msra.mxu0 %v3145_v18  ;;  %1800 = vmatprep.mubr.f32.mxu0 %v3051_v3 }
0x1bde   :  { %2700 = vmatprep.subr.bf16.mxu0 %v3160_v23 }
0x1be1   :  { %2702 = vmatpush1.bf16.msra.mxu0 %v3173_v27 }
0x1be2   :  { %2704 = vmatprep.subr.bf16.mxu0 %v3183_v30 }
0x1be5   :  { %2706 = vmatpush1.bf16.msra.mxu0 %v3198_v34 }
0x1be6   :  { %2708 = vmatprep.subr.bf16.mxu0 %v3208_v37 }
0x1be9   :  { %2710 = vmatpush1.bf16.msra.mxu0 %v3217_v39 }
0x1bea   :  { %2712 = vmatprep.subr.bf16.mxu0 %v3140_v16 }
0x1caf   :  { %v1694_v60 = vpop.f32.mrb[14].mxu0 }
0x1cb0   :  { %v1699_v29 = vadd.f32 %v1694_v60, %v256_v31  ;;  %v1696_v32 = vpop.f32.mrb[15].mxu0 }
0x1cb1   :  { %v1700_v33 = vadd.f32 %v1696_v32, %v258_v59 }
0x1cb2   :  { %v2406_v36 = vmul.f32 -1.442695, %v1699_v29 }
0x1cb3   :  { %2987 = vtanh.f32 %v1700_v33  ;;  %v2407_v44 = vmul.f32 -1.442695, %v1700_v33 }
0x1cb4   :  { %2989 = vpow2.f32 %v2406_v36  ;;  %v2059_v36 = vld [vmem:[%s3711_s4 + $0x18] sm:$0xff] }
0x1cbd   :  { %v2988_v35 = vpop.eup %2987 }
0x1cbe   :  { %1716 = vrot.lane.b32.xlu0 %v2988_v35, %s3052_s23  ;;  %v2990_v38 = vpop.eup %2989  ;;  %v2057_v35 = vld [vmem:[%s3711_s4 + $0x8] sm:$0xff] }
0x1cbf   :  { %v1707_v63 = vadd.f32 1.0, %v2990_v38  ;;  %v2056_v38 = vld [vmem:[%s3711_s4] sm:$0xff] }
0x1cc1   :  { %2991 = vrcp.f32 %v1707_v63  ;;  %v2743_v63 = vpack.c.bf16 %v2059_v36, %v2057_v35  ;;  %v2170_v36 = vld [vmem:[%s3714_s6] sm:$0xff] }
0x1cc3   :  { %2744 = vmatprep.subr.bf16.mxu1 %v2743_v63 }
0x1ccb   :  { %v2992_v0 = vpop.eup %2991 }
0x1ccc   :  { %v1714_v4 = vmul.f32 %v2992_v0, %v1616_v20 }
0x1d30   :  { %v1717_v40 = vpop.permute.xlu0 %1716 }
0x1d31   :  { %v1719_v41 = vmul.f32 %v2992_v0, %v1717_v40  ;;  %v2058_v0 = vld [vmem:[%s3711_s4 + $0x10] sm:$0xff]  ;;  %v2061_v40 = vld [vmem:[%s3711_s4 + $0x28] sm:$0xff] }
0x1d33   :  { %1721 = vrot.lane.b32.xlu1 %v1719_v41, %s3052_s23  ;;  %v2063_v41 = vld [vmem:[%s3711_s4 + $0x38] sm:$0xff] }
0x1da5   :  { %v1722_v5 = vpop.permute.xlu1 %1721 }
0x1da6   :  { %v1724_v42 = vadd.f32 %v1722_v5, %v1714_v4  ;;  %v2745_v4 = vpack.c.bf16 %v2058_v0, %v2056_v38  ;;  %v2747_v5 = vpack.c.bf16 %v2063_v41, %v2061_v40  ;;  %v2171_v38 = vld [vmem:[%s3714_s6 + $0x8] sm:$0xff] }
0x1da7   :  { %v2764_v40 = vpack.c.bf16 %v2171_v38, %v2170_v36 }
0x1da8   :  { %2993 = vtanh.f32 %v1724_v42  ;;  %2746 = vmatpush1.bf16.msra.mxu1 %v2745_v4  ;;  %v2172_v4 = vld [vmem:[%s3714_s6 + $0x10] sm:$0xff] }
0x1da9   :  { %2995 = vpow2.f32 %v2407_v44  ;;  %2748 = vmatprep.subr.bf16.mxu1 %v2747_v5  ;;  %v2173_v5 = vld [vmem:[%s3714_s6 + $0x18] sm:$0xff] }
0x1db2   :  { %v2994_v43 = vpop.eup %2993 }
0x1db3   :  { %1727 = vrot.lane.b32.xlu0 %v2994_v43, %s3052_s23  ;;  %v2996_v57 = vpop.eup %2995  ;;  %v2062_v43 = vld [vmem:[%s3711_s4 + $0x30] sm:$0xff] }
0x1db4   :  { %v1708_v58 = vadd.f32 1.0, %v2996_v57  ;;  %v2055_v57 = vld [vmem:[%s3709_s0 + $0x78] sm:$0xff] }
0x1db6   :  { %2997 = vrcp.f32 %v1708_v58 }
0x1dc0   :  { %v2998_v45 = vpop.eup %2997 }
0x1e25   :  { %v1728_v46 = vpop.permute.xlu0 %1727 }
0x1e26   :  { %v1730_v48 = vmul.f32 %v2998_v45, %v1728_v46 }
0x1e28   :  { %2408 = vmatmul.mubr.msk.f32.vlgmr.msra.gmra.mrb[16].mxu0 %vm328_vm1, %v1730_v48 }
0x1e29   :  { %2714 = vmatpush1.bf16.msra.mxu0 %v3145_v18  ;;  %1908 = vmatprep.mubr.f32.mxu0 %v3051_v3 }
0x1e2a   :  { %2716 = vmatprep.subr.bf16.mxu0 %v3160_v23 }
0x1e2d   :  { %2718 = vmatpush1.bf16.msra.mxu0 %v3173_v27 }
0x1e2e   :  { %2720 = vmatprep.subr.bf16.mxu0 %v3183_v30 }
0x1e31   :  { %2722 = vmatpush1.bf16.msra.mxu0 %v3198_v34 }
0x1e32   :  { %2724 = vmatprep.subr.bf16.mxu0 %v3208_v37 }
0x1e35   :  { %2726 = vmatpush1.bf16.msra.mxu0 %v3217_v39 }
0x1e36   :  { %2728 = vmatprep.subr.bf16.mxu0 %v3140_v16 }
0x1efb   :  { %v1802_v50 = vpop.f32.mrb[16].mxu0 }
0x1efc   :  { %v1807_v51 = vadd.f32 %v1802_v50, %v262_v47  ;;  %v1804_v52 = vpop.f32.mrb[17].mxu0 }
0x1efd   :  { %v1808_v61 = vadd.f32 %v1804_v52, %v264_v49  ;;  %v2064_v52 = vld [vmem:[%s3712_s5] sm:$0x3] }
0x1efe   :  { %v2409_v6 = vmul.f32 -1.442695, %v1807_v51 }
0x1eff   :  { %2999 = vtanh.f32 %v1808_v61  ;;  %v2410_v14 = vmul.f32 -1.442695, %v1808_v61 }
0x1f00   :  { %3001 = vpow2.f32 %v2409_v6 }
0x1f09   :  { %v3000_v62 = vpop.eup %2999 }
0x1f0a   :  { %1824 = vrot.lane.b32.xlu1 %v3000_v62, %s3052_s23  ;;  %v3002_v55 = vpop.eup %3001  ;;  %v2069_v62 = vrot.slane %v2064_v52, %v60_v24 }
0x1f0b   :  { %v1815_v56 = vadd.f32 1.0, %v3002_v55  ;;  %v2073_v55 = vrot.slane %v2064_v52, %v64_v12  ;;  %v2179_v12 = vld [vmem:[%s3713_s7 + $0x8] sm:$0xff] }
0x1f0d   :  { %3003 = vrcp.f32 %v1815_v56  ;;  %v274_v56 = vadd.f32 %v3346_v13, %v3362_v25  ;;  %v2180_v13 = vld [vmem:[%s3713_s7 + $0x10] sm:$0xff]  ;;  %v2182_v25 = vld [vmem:[%s3713_s7 + $0x20] sm:$0xff] }
0x1f17   :  { %v3004_v16 = vpop.eup %3003 }
0x1f18   :  { %v1822_v7 = vmul.f32 %v3004_v16, %v1724_v42  ;;  %v2060_v42 = vld [vmem:[%s3711_s4 + $0x20] sm:$0xff] }
0x1f19   :  { %v2749_v44 = vpack.c.bf16 %v2062_v43, %v2060_v42  ;;  %v2767_v42 = vpack.c.bf16 %v2173_v5, %v2172_v4  ;;  %v2174_v43 = vld [vmem:[%s3714_s6 + $0x20] sm:$0xff] }
0x1f1b   :  { %2750 = vmatpush1.bf16.msra.mxu1 %v2749_v44  ;;  %v2175_v44 = vld [vmem:[%s3714_s6 + $0x28] sm:$0xff] }
0x1f1e   :  { %2417 = vmatmul.mubr.msk.f32.vlgmr.msra.gmra.mrb[32].mxu1 %vm68_vm0, %v2055_v57  ;;  %v2770_v57 = vpack.c.bf16 %v2175_v44, %v2174_v43 }
0x1f1f   :  { %2457 = vmatprep.mubr.msk.f32.mxu1 %vm3054_vm2, %v3051_v3 }
0x1f7c   :  { %v1825_v19 = vpop.permute.xlu1 %1824 }
0x1f7d   :  { %v1827_v1 = vmul.f32 %v3004_v16, %v1825_v19  ;;  %v276_v16 = vadd.f32 %v3351_v15, %v3355_v17  ;;  %v2752_v15 = vpack.c.bf16 %v2179_v12, %v2178_v9 }
0x1f7f   :  { %1829 = vrot.lane.b32.xlu0 %v1827_v1, %s3052_s23 }
0x1ff1   :  { %v1830_v8 = vpop.permute.xlu0 %1829  ;;  %v2145_v51 = vpop.f32.mrb[32].mxu1 }
0x1ff2   :  { %v1832_v2 = vadd.f32 %v1830_v8, %v1822_v7  ;;  %v2147_v61 = vpop.f32.mrb[33].mxu1  ;;  %v2146_v6 = vadd.f32 %v2145_v51, %v2069_v62 }
0x1ff4   :  { %3005 = vtanh.f32 %v1832_v2 }
0x1ff5   :  { %3007 = vpow2.f32 %v2410_v14  ;;  %v2183_v14 = vld [vmem:[%s3713_s7 + $0x28] sm:$0xff] }
0x1ffe   :  { %v3006_v20 = vpop.eup %3005 }
0x1fff   :  { %1835 = vrot.lane.b32.xlu1 %v3006_v20, %s3052_s23  ;;  %v3008_v21 = vpop.eup %3007  ;;  %v3053_v20 = vmov 0.0|0.0  }
0x2000   :  { %v1816_v22 = vadd.f32 1.0, %v3008_v21  ;;  %2751 = vmatprep.subr.bf16.mxu1 %v3053_v20 }
0x2001   :  { %2753 = vmatpush3.bf16.msra.mxu1 %v2752_v15 }
0x2002   :  { %3009 = vrcp.f32 %v1816_v22  ;;  %2754 = vmatprep.subr.bf16.mxu1 %v3053_v20 }
0x200c   :  { %v3010_v26 = vpop.eup %3009 }
0x2071   :  { %v1836_v28 = vpop.permute.xlu1 %1835 }
0x2072   :  { %v1838_v53 = vmul.f32 %v3010_v26, %v1836_v28  ;;  %v2758_v26 = vpack.c.bf16 %v2183_v14, %v2182_v25  ;;  %v2184_v28 = vld [vmem:[%s3713_s7 + $0x30] sm:$0xff] }
0x2074   :  { %2411 = vmatmul.mubr.msk.f32.vlgmr.msra.gmra.mrb[18].mxu0 %vm328_vm1, %v1838_v53  ;;  %v2185_v53 = vld [vmem:[%s3713_s7 + $0x38] sm:$0xff] }
0x2075   :  { %2730 = vmatpush1.bf16.msra.mxu0 %v3145_v18  ;;  %2016 = vmatprep.mubr.f32.mxu0 %v3051_v3  ;;  %v270_v18 = vadd.f32 %v3343_v11, %v3355_v17  ;;  %v2181_v17 = vld [vmem:[%s3713_s7 + $0x18] sm:$0xff] }
0x2076   :  { %2732 = vmatprep.subr.bf16.mxu0 %v3160_v23  ;;  %v2755_v24 = vpack.c.bf16 %v2181_v17, %v2180_v13 }
0x2078   :  { %2756 = vmatpush3.bf16.msra.mxu1 %v2755_v24 }
0x2079   :  { %2734 = vmatpush1.bf16.msra.mxu0 %v3173_v27  ;;  %2757 = vmatprep.subr.bf16.mxu1 %v3053_v20 }
0x207a   :  { %2736 = vmatprep.subr.bf16.mxu0 %v3183_v30 }
0x207c   :  { %2759 = vmatpush3.bf16.msra.mxu1 %v2758_v26 }
0x207d   :  { %2738 = vmatpush1.bf16.msra.mxu0 %v3198_v34  ;;  %2760 = vmatprep.subr.bf16.mxu1 %v3053_v20 }
0x207e   :  { %2740 = vmatprep.subr.bf16.mxu0 %v3208_v37 }
0x2081   :  { %2742 = vmatpush1.bf16.msra.mxu0 %v3217_v39 }
0x2147   :  { %v1910_v31 = vpop.f32.mrb[18].mxu0 }
0x2148   :  { %v1915_v59 = vadd.f32 %v1910_v31, %v268_v54  ;;  %v1912_v60 = vpop.f32.mrb[19].mxu0  ;;  %v2761_v54 = vpack.c.bf16 %v2185_v53, %v2184_v28  ;;  %v2418_v31 = vmul.f32 -1.442695, %v2146_v6 }
0x2149   :  { %v1916_v23 = vadd.f32 %v1912_v60, %v270_v18 }
0x214a   :  { %v2412_v30 = vmul.f32 -1.442695, %v1915_v59  ;;  %2762 = vmatpush3.bf16.msra.mxu1 %v2761_v54 }
0x214b   :  { %3011 = vtanh.f32 %v1916_v23  ;;  %v2413_v45 = vmul.f32 -1.442695, %v1916_v23  ;;  %2763 = vmatprep.subr.bf16.mxu1 %v3053_v20 }
0x214c   :  { %3013 = vpow2.f32 %v2412_v30 }
0x2155   :  { %v3012_v27 = vpop.eup %3011 }
0x2156   :  { %1932 = vrot.lane.b32.xlu0 %v3012_v27, %s3052_s23  ;;  %v3014_v34 = vpop.eup %3013 }
0x2157   :  { %v1923_v37 = vadd.f32 1.0, %v3014_v34 }
0x2159   :  { %3015 = vrcp.f32 %v1923_v37 }
0x2163   :  { %v3016_v39 = vpop.eup %3015 }
0x2164   :  { %v1930_v10 = vmul.f32 %v3016_v39, %v1832_v2  ;;  %v2148_v2 = vadd.f32 %v2147_v61, %v2073_v55 }
0x2166   :  { %v2419_v60 = vmul.f32 -1.442695, %v2148_v2 }
0x21c8   :  { %v1933_v29 = vpop.permute.xlu0 %1932 }
0x21c9   :  { %v1935_v32 = vmul.f32 %v3016_v39, %v1933_v29 }
0x21cb   :  { %1937 = vrot.lane.b32.xlu1 %v1935_v32, %s3052_s23 }
0x223d   :  { %v1938_v11 = vpop.permute.xlu1 %1937 }
0x223e   :  { %v3586_v33 = vadd.f32 %v1938_v11, %v1930_v10 }
0x2240   :  { %3017 = vtanh.f32 %v3586_v33 }
0x2241   :  { %3019 = vpow2.f32 %v2413_v45 }
0x224a   :  { %v3018_v58 = vpop.eup %3017 }
0x224b   :  { %1943 = vrot.lane.b32.xlu0 %v3018_v58, %s3052_s23  ;;  %v3020_v46 = vpop.eup %3019  ;;  %v2177_v58 = vld [vmem:[%s3714_s6 + $0x38] sm:$0xff] }
0x224c   :  { %v1924_v48 = vadd.f32 1.0, %v3020_v46 }
0x224e   :  { %3021 = vrcp.f32 %v1924_v48 }
0x2258   :  { %v3022_v47 = vpop.eup %3021 }
0x22bd   :  { %v1944_v49 = vpop.permute.xlu0 %1943 }
0x22be   :  { %v1946_v50 = vmul.f32 %v3022_v47, %v1944_v49 }
0x22c0   :  { %2414 = vmatmul.mubr.msk.f32.vlgmr.msra.gmra.mrb[20].mxu0 %vm328_vm1, %v1946_v50 }
0x2393   :  { %v2018_v19 = vpop.f32.mrb[20].mxu0 }
0x2394   :  { %v2023_v1 = vadd.f32 %v2018_v19, %v274_v56  ;;  %v2020_v7 = vpop.f32.mrb[21].mxu0 }
0x2395   :  { %v3630_v8 = vadd.f32 %v2020_v7, %v276_v16  ;;  %v2422_v16 = vld [vmem:[%s3715_s8] ss:$0 sm:$0xff] }
0x2396   :  { %v2415_v18 = vmul.f32 -1.442695, %v2023_v1 }
0x2397   :  { %3023 = vtanh.f32 %v3630_v8  ;;  %v2416_v50 = vmul.f32 -1.442695, %v3630_v8 }
0x2398   :  { %3025 = vtanh.f32 %v2148_v2 }
0x2399   :  { %3027 = vpow2.f32 %v2415_v18 }
0x239a   :  { %3029 = vpow2.f32 %v2418_v31 }
0x239b   :  { %3031 = vpow2.f32 %v2419_v60 }
0x23a1   :  { %v3024_v21 = vpop.eup %3023 }
0x23a2   :  { %2040 = vrot.lane.b32.xlu1 %v3024_v21, %s3052_s23  ;;  %v3026_v22 = vpop.eup %3025 }
0x23a3   :  { %v3028_v59 = vpop.eup %3027 }
0x23a4   :  { %v3030_v23 = vpop.eup %3029  ;;  %v2031_v27 = vadd.f32 1.0, %v3028_v59 }
0x23a5   :  { %v2156_v30 = vadd.f32 1.0, %v3030_v23  ;;  %v3032_v34 = vpop.eup %3031 }
0x23a6   :  { %2164 = vrot.lane.b32.xlu1 %v3026_v22, %s3052_s23  ;;  %3033 = vrcp.f32 %v2031_v27  ;;  %v2157_v29 = vadd.f32 1.0, %v3032_v34 }
0x23a7   :  { %3035 = vrcp.f32 %v2156_v30 }
0x23a8   :  { %3037 = vrcp.f32 %v2157_v29 }
0x23b0   :  { %v3034_v37 = vpop.eup %3033 }
0x23b1   :  { %v3036_v10 = vpop.eup %3035  ;;  %v2038_v46 = vmul.f32 %v3034_v37, %v3586_v33 }
0x23b2   :  { %v3038_v63 = vpop.eup %3037 }
0x2414   :  { %v2041_v39 = vpop.permute.xlu1 %2040 }
0x2415   :  { %v2043_v32 = vmul.f32 %v3034_v37, %v2041_v39 }
0x2417   :  { %2045 = vrot.lane.b32.xlu0 %v2043_v32, %s3052_s23 }
0x2418   :  { %v2165_v11 = vpop.permute.xlu1 %2164 }
0x2419   :  { %v2167_v35 = vmul.f32 %v3036_v10, %v2165_v11 }
0x241b   :  { %3039 = vtanh.f32 %v2167_v35 }
0x2425   :  { %v3040_v0 = vpop.eup %3039 }
0x2426   :  { %v2169_v41 = vmul.f32 %v3040_v0, %v3038_v63 }
0x2428   :  { %2458 = vmatmul.mubr.msk.f32.vlgmr.msra.gmra.mrb[34].mxu1 %vm328_vm1, %v2169_v41 }
0x2429   :  { %2765 = vmatpush3.bf16.msra.mxu1 %v2764_v40  ;;  %2476 = vmatprep.mubr.msk.f32.mxu1 %vm3054_vm2, %v3051_v3  ;;  %v2176_v3 = vld [vmem:[%s3714_s6 + $0x30] sm:$0xff] }
0x242a   :  { %2766 = vmatprep.subr.bf16.mxu1 %v3053_v20  ;;  %v2773_v45 = vpack.c.bf16 %v2177_v58, %v2176_v3 }
0x242d   :  { %2768 = vmatpush3.bf16.msra.mxu1 %v2767_v42 }
0x242e   :  { %2769 = vmatprep.subr.bf16.mxu1 %v3053_v20 }
0x2431   :  { %2771 = vmatpush3.bf16.msra.mxu1 %v2770_v57 }
0x2432   :  { %2772 = vmatprep.subr.bf16.mxu1 %v3053_v20 }
0x2435   :  { %2774 = vmatpush3.bf16.msra.mxu1 %v2773_v45 }
0x2489   :  { %v2046_v48 = vpop.permute.xlu0 %2045 }
0x248a   :  { %v2048_v47 = vadd.f32 %v2046_v48, %v2038_v46 }
0x248c   :  { %3041 = vtanh.f32 %v2048_v47 }
0x248d   :  { %3043 = vpow2.f32 %v2416_v50 }
0x2496   :  { %v3042_v49 = vpop.eup %3041 }
0x2497   :  { %2051 = vrot.lane.b32.xlu0 %v3042_v49, %s3052_s23  ;;  %v3044_v51 = vpop.eup %3043 }
0x2498   :  { %v2032_v52 = vadd.f32 1.0, %v3044_v51 }
0x249a   :  { %3045 = vrcp.f32 %v2032_v52 }
0x24a4   :  { %v3046_v6 = vpop.eup %3045 }
0x24fb   :  { %v2255_v61 = vpop.f32.mrb[34].mxu1 }
0x24fc   :  { %v2459_v62 = vpop.f32.mrb[35].mxu1 }
0x2509   :  { %v2052_v55 = vpop.permute.xlu0 %2051 }
0x250a   :  { %v2054_v56 = vmul.f32 %v3046_v6, %v2052_v55 }
0x250c   :  { %2477 = vmatmul.mubr.msk.f32.vlgmr.msra.gmra.mrb[36].mxu1 %vm328_vm1, %v2054_v56 }
0x25df   :  { %v2328_v33 = vpop.f32.mrb[36].mxu1 }
0x25e0   :  { %v2329_v19 = vadd.f32 %v2328_v33, %v2255_v61  ;;  %v2478_v1 = vpop.f32.mrb[37].mxu1 }
0x25e2   :  { %v2339_v7 = vadd.f32 %v2422_v16, %v2329_v19 }
0x25e4   :  { %2340 = vmax.xlane.f32.xlu1 %v2339_v7 }
0x2671   :  { %v2341_v8 = vpop.xlane.xlu1 %2340 }
0x2672   :  { %v2342_v2 = vsub.f32 %v2339_v7, %v2341_v8 }
0x2674   :  { %v2343_v20 = vmul.f32 1.442695, %v2342_v2 }
0x2676   :  { %3047 = vpow2.f32 %v2343_v20 }
0x2680   :  { %v3048_v9 = vpop.eup %3047 }
0x2681   :  { %2345 = vadd.xlane.f32.xlu0 %v3048_v9 }
0x270e   :  { %v2346_v12 = vpop.xlane.xlu0 %2345 }
0x270f   :  { %3049 = vrcp.f32 %v2346_v12 }
0x2719   :  { %v3050_v13 = vpop.eup %3049 }
0x271a   :  { %v2348_v15 = vmul.f32 %v3050_v13, %v3048_v9 }
0x271c   :  { %2349 = vst [vmem:[%s3716_s9] sm:$0xff] %v2348_v15 }

</bundles_post_ra>
